<compile_context>
chip_gen: v7x
topology: tpu7x:2x2x1
jax: 0.10.0
libtpu: 0.0.40
codegen_flags: <defaults>
</compile_context>

<pallas_src>
import jax
import jax.numpy as jnp
import numpy as np
from jax.experimental import pallas as pl
from jax.experimental.pallas import tpu as pltpu

# --- small, module-consistent hyperparameters -------------------------------
EMBED_DIM = 768            # the module hardcodes embedding_dim = 768
SEQ_LEN = 16
BATCH = 2
N_FILTERS = 8
FILTER_SIZES = (2, 3, 4)
OUTPUT_DIM = 4
VOCAB = 1000

TOKENS = BATCH * SEQ_LEN                 # 32 gathered rows == matmul M dim
TOTAL_TAPS = sum(FILTER_SIZES)           # 9 taps -> 72 packed columns
LANES = 128                              # lane-dense packed filter/tap axis
CAT_DIM = len(FILTER_SIZES) * N_FILTERS  # 24 pooled features
M_PAD = 8                                # sublane-padded FC / output M dim
VOCAB_PAD = 1024                         # lane/sublane-aligned vocab for one-hot


def _bert_cnn_kernel(ids_ref, table_ref, w_ref, bias_ref, fcw_ref, fcb_ref,
                     out_ref):
    """Fused one-hot gather + packed conv matmul + pool + FC (single call)."""
    # ---- 1. fused embedding lookup (bert(text)[0] stand-in) ----------------
    # Table is VMEM-resident (one contiguous prologue DMA by the BlockSpec);
    # the gather is a single one-hot MXU matmul -- no per-row DMAs, no waits.
    ids = ids_ref[...]                                          # [TOKENS, 1] i32
    vocab_iota = jax.lax.broadcasted_iota(jnp.int32, (TOKENS, VOCAB_PAD), 1)
    onehot = jnp.where(vocab_iota == ids, 1.0, 0.0).astype(jnp.bfloat16)
    emb = jnp.dot(onehot, table_ref[...],
                  preferred_element_type=jnp.float32)           # exact gather
    emb = emb.astype(jnp.bfloat16)                              # lossless: table is bf16

    # ---- 2. ONE lane-dense MXU matmul over all conv taps -------------------
    # [TOKENS, E] bf16 x [E, 128] bf16 -> [TOKENS, 128] f32 accumulate.
    y = jnp.dot(emb, w_ref[...], preferred_element_type=jnp.float32)
    y = y.reshape(BATCH, SEQ_LEN, LANES)                        # leading-dim split

    # ---- 3. windowed tap-sum + max-over-time per filter size (f32 VPU) -----
    pooled = []
    off = 0
    for fs in FILTER_SIZES:
        L = SEQ_LEN - fs + 1
        acc = y[:, 0:L, off:off + N_FILTERS]
        for j in range(1, fs):
            acc = acc + y[:, j:j + L,
                          off + j * N_FILTERS: off + (j + 1) * N_FILTERS]
        pooled.append(jnp.max(acc, axis=1))                     # [B, F]
        off += fs * N_FILTERS

    # ---- 4. bias + ReLU hoisted past the pool; single bf16 lane-dense FC ---
    # cat: [B, 24] pooled features, zero-padded to [B, 128] lanes ...
    cat = jnp.concatenate(
        pooled + [jnp.zeros((BATCH, LANES - CAT_DIM), jnp.float32)], axis=1)
    cat = jnp.maximum(cat + bias_ref[...], 0.0)                 # pad lanes stay 0
    # ... and to [8, 128] sublanes so the output store is fully unmasked.
    cat = jnp.concatenate(
        [cat, jnp.zeros((M_PAD - BATCH, LANES), jnp.float32)], axis=0)
    out_ref[...] = (jnp.dot(cat.astype(jnp.bfloat16), fcw_ref[...],
                            preferred_element_type=jnp.float32)
                    + fcb_ref[...])                             # [8, 128] f32


def pack_params(params):
    """Repack PyTorch-shaped params into lane-dense kernel operands."""
    # conv taps: w{k} is [fs, E, F]; concat taps -> [9, E, F] -> [E, 72] pad 128
    w_all = jnp.concatenate([params["w0"], params["w1"], params["w2"]], axis=0)
    w_all = jnp.transpose(w_all, (1, 0, 2)).reshape(EMBED_DIM,
                                                    TOTAL_TAPS * N_FILTERS)
    w_all = jnp.pad(w_all, ((0, 0), (0, LANES - TOTAL_TAPS * N_FILTERS)))
    w_all = w_all.astype(jnp.bfloat16)

    # conv biases packed into one lane-dense [1, 128] f32 row (order fs2,fs3,fs4)
    bias = jnp.concatenate([params["b0"], params["b1"], params["b2"]], axis=1)
    bias = jnp.pad(bias, ((0, 0), (0, LANES - CAT_DIM)))

    # fc weight [3F, O] -> bf16 [128, 128]; fc bias [1, O] -> f32 [1, 128]
    fcw = jnp.pad(params["fcw"],
                  ((0, LANES - CAT_DIM), (0, LANES - OUTPUT_DIM)))
    fcw = fcw.astype(jnp.bfloat16)
    fcb = jnp.pad(params["fcb"], ((0, 0), (0, LANES - OUTPUT_DIM)))
    return w_all, bias, fcw, fcb


def pack_table(embed_table_f32):
    """Zero-pad vocab to 1024 and cast to the MXU-native bf16."""
    table = jnp.pad(embed_table_f32, ((0, VOCAB_PAD - VOCAB), (0, 0)))
    return table.astype(jnp.bfloat16)


@jax.jit
def bert_cnn_forward(text, table_bf16, w_all, bias, fcw, fcb):
    """text: [B, S] int32 token ids.  Returns logits [B, OUTPUT_DIM] f32."""
    ids = jnp.clip(text.reshape(TOKENS, 1).astype(jnp.int32), 0, VOCAB - 1)
    out = pl.pallas_call(
        _bert_cnn_kernel,
        out_shape=jax.ShapeDtypeStruct((M_PAD, LANES), jnp.float32),
        in_specs=[
            pl.BlockSpec(memory_space=pltpu.MemorySpace.VMEM),   # token ids
            pl.BlockSpec(memory_space=pltpu.MemorySpace.VMEM),   # table (1.5 MiB)
            pl.BlockSpec(memory_space=pltpu.MemorySpace.VMEM),   # packed conv W
            pl.BlockSpec(memory_space=pltpu.MemorySpace.VMEM),   # packed conv b
            pl.BlockSpec(memory_space=pltpu.MemorySpace.VMEM),   # fc W (bf16, padded)
            pl.BlockSpec(memory_space=pltpu.MemorySpace.VMEM),   # fc b (padded)
        ],
        out_specs=pl.BlockSpec(memory_space=pltpu.MemorySpace.VMEM),
    )(ids, table_bf16, w_all, bias, fcw, fcb)
    return out[:BATCH, :OUTPUT_DIM]                              # strip padding


def _reference(embedded, params):
    """Pure-JAX f32 reference reproducing the PyTorch forward semantics."""
    pooled_all = []
    for k, fs in enumerate(FILTER_SIZES):
        w, b = params[f"w{k}"], params[f"b{k}"]
        L = SEQ_LEN - fs + 1
        conv = jnp.zeros((BATCH, L, N_FILTERS), jnp.float32)
        for j in range(fs):
            conv = conv + jnp.einsum("ble,ef->blf", embedded[:, j:j + L, :], w[j])
        conv = jnp.maximum(conv + b, 0.0)                   # relu(conv_k(x))
        pooled_all.append(jnp.max(conv, axis=1))            # max_pool1d
    cat = jnp.concatenate(pooled_all, axis=1)               # dropout == identity
    return cat @ params["fcw"] + params["fcb"]               # self.fc(cat)


if __name__ == "__main__":
    key = jax.random.PRNGKey(0)
    ks = jax.random.split(key, 12)

    # ---- BERT stand-in inputs: embedding table + token ids -----------------
    embed_table = jax.random.normal(ks[0], (VOCAB, EMBED_DIM), jnp.float32) * 0.05
    text = jax.random.randint(ks[1], (BATCH, SEQ_LEN), 0, VOCAB)

    # ---- deterministic parameter init (shapes from the module __init__) ----
    def conv_w(k, fs):
        # PyTorch: [n_filters, 1, fs, E] -> kernel layout [fs, E, n_filters]
        return jax.random.normal(k, (fs, EMBED_DIM, N_FILTERS), jnp.float32) * 0.05

    params = {
        "w0": conv_w(ks[2], FILTER_SIZES[0]),
        "b0": jax.random.normal(ks[3], (1, N_FILTERS), jnp.float32) * 0.05,
        "w1": conv_w(ks[4], FILTER_SIZES[1]),
        "b1": jax.random.normal(ks[5], (1, N_FILTERS), jnp.float32) * 0.05,
        "w2": conv_w(ks[6], FILTER_SIZES[2]),
        "b2": jax.random.normal(ks[7], (1, N_FILTERS), jnp.float32) * 0.05,
        # PyTorch fc.weight is [O, 3F]; pass transposed [3F, O]
        "fcw": jax.random.normal(ks[8], (CAT_DIM, OUTPUT_DIM), jnp.float32) * 0.05,
        "fcb": jax.random.normal(ks[9], (1, OUTPUT_DIM), jnp.float32) * 0.05,
    }

    w_all, bias, fcw, fcb = pack_params(params)
    table_bf16 = pack_table(embed_table)

    out = jax.block_until_ready(
        bert_cnn_forward(text, table_bf16, w_all, bias, fcw, fcb))

    embedded = embed_table[text]                             # f32 reference path
    ref = jax.block_until_ready(_reference(embedded, params))

    np.testing.assert_allclose(np.asarray(out), np.asarray(ref),
                               rtol=1e-2, atol=1e-2)
    print("KERNEL_OK")
</pallas_src>

<mosaic_0001>
module attributes {stable_mosaic.version = 11 : i64} {
  func.func @_bert_cnn_kernel(%arg0: memref<32x1xi32, #tpu.memory_space<vmem>>, %arg1: memref<1024x768xbf16, #tpu.memory_space<vmem>>, %arg2: memref<768x128xbf16, #tpu.memory_space<vmem>>, %arg3: memref<1x128xf32, #tpu.memory_space<vmem>>, %arg4: memref<128x128xbf16, #tpu.memory_space<vmem>>, %arg5: memref<1x128xf32, #tpu.memory_space<vmem>>, %arg6: memref<8x128xf32, #tpu.memory_space<vmem>>) attributes {dimension_semantics = [], scalar_prefetch = 0 : i64, scratch_operands = 0 : i64, tpu.core_type = #tpu.core_type<tc>} {
    %c0 = arith.constant 0 : index
    %c0_0 = arith.constant 0 : index
    %0 = vector.load %arg0[%c0, %c0_0] : memref<32x1xi32, #tpu.memory_space<vmem>>, vector<32x1xi32>
    %1 = tpu.iota {dimensions = array<i32: 1>} : vector<32x1024xi32>
    %2 = vector.broadcast %0 : vector<32x1xi32> to vector<32x1024xi32>
    %3 = arith.cmpi eq, %1, %2 : vector<32x1024xi32>
    %cst = arith.constant 1.000000e+00 : f32
    %cst_1 = arith.constant 0.000000e+00 : f32
    %4 = vector.broadcast %cst : f32 to vector<32x1024xf32>
    %5 = vector.broadcast %cst_1 : f32 to vector<32x1024xf32>
    %6 = arith.select %3, %4, %5 : vector<32x1024xi1>, vector<32x1024xf32>
    %7 = arith.truncf %6 : vector<32x1024xf32> to vector<32x1024xbf16>
    %c0_2 = arith.constant 0 : index
    %c0_3 = arith.constant 0 : index
    %8 = vector.load %arg1[%c0_2, %c0_3] : memref<1024x768xbf16, #tpu.memory_space<vmem>>, vector<1024x768xbf16>
    %cst_4 = arith.constant dense<0.000000e+00> : vector<32x768xf32>
    %9 = tpu.matmul %7, %8, %cst_4 {dimension_numbers = #tpu.dot_dimension_numbers<[1], [0], [0], [1], [0, 0, 1, 1], [], []>} : vector<32x1024xbf16>, vector<1024x768xbf16>, vector<32x768xf32> -> vector<32x768xf32>
    %10 = arith.truncf %9 : vector<32x768xf32> to vector<32x768xbf16>
    %c0_5 = arith.constant 0 : index
    %c0_6 = arith.constant 0 : index
    %11 = vector.load %arg2[%c0_5, %c0_6] : memref<768x128xbf16, #tpu.memory_space<vmem>>, vector<768x128xbf16>
    %cst_7 = arith.constant dense<0.000000e+00> : vector<32x128xf32>
    %12 = tpu.matmul %10, %11, %cst_7 {dimension_numbers = #tpu.dot_dimension_numbers<[1], [0], [0], [1], [0, 0, 1, 1], [], []>} : vector<32x768xbf16>, vector<768x128xbf16>, vector<32x128xf32> -> vector<32x128xf32>
    %13 = vector.shape_cast %12 : vector<32x128xf32> to vector<2x16x128xf32>
    %14 = vector.extract_strided_slice %13 {offsets = [0, 0, 0], sizes = [2, 15, 8], strides = [1, 1, 1]} : vector<2x16x128xf32> to vector<2x15x8xf32>
    %15 = vector.extract_strided_slice %13 {offsets = [0, 1, 8], sizes = [2, 15, 8], strides = [1, 1, 1]} : vector<2x16x128xf32> to vector<2x15x8xf32>
    %16 = arith.addf %14, %15 : vector<2x15x8xf32>
    %cst_8 = arith.constant dense<0xFF800000> : vector<2x8xf32>
    %17 = vector.multi_reduction <maximumf>, %16, %cst_8 [1] : vector<2x15x8xf32> to vector<2x8xf32>
    %18 = vector.extract_strided_slice %13 {offsets = [0, 0, 16], sizes = [2, 14, 8], strides = [1, 1, 1]} : vector<2x16x128xf32> to vector<2x14x8xf32>
    %19 = vector.extract_strided_slice %13 {offsets = [0, 1, 24], sizes = [2, 14, 8], strides = [1, 1, 1]} : vector<2x16x128xf32> to vector<2x14x8xf32>
    %20 = arith.addf %18, %19 : vector<2x14x8xf32>
    %21 = vector.extract_strided_slice %13 {offsets = [0, 2, 32], sizes = [2, 14, 8], strides = [1, 1, 1]} : vector<2x16x128xf32> to vector<2x14x8xf32>
    %22 = arith.addf %20, %21 : vector<2x14x8xf32>
    %cst_9 = arith.constant dense<0xFF800000> : vector<2x8xf32>
    %23 = vector.multi_reduction <maximumf>, %22, %cst_9 [1] : vector<2x14x8xf32> to vector<2x8xf32>
    %24 = vector.extract_strided_slice %13 {offsets = [0, 0, 40], sizes = [2, 13, 8], strides = [1, 1, 1]} : vector<2x16x128xf32> to vector<2x13x8xf32>
    %25 = vector.extract_strided_slice %13 {offsets = [0, 1, 48], sizes = [2, 13, 8], strides = [1, 1, 1]} : vector<2x16x128xf32> to vector<2x13x8xf32>
    %26 = arith.addf %24, %25 : vector<2x13x8xf32>
    %27 = vector.extract_strided_slice %13 {offsets = [0, 2, 56], sizes = [2, 13, 8], strides = [1, 1, 1]} : vector<2x16x128xf32> to vector<2x13x8xf32>
    %28 = arith.addf %26, %27 : vector<2x13x8xf32>
    %29 = vector.extract_strided_slice %13 {offsets = [0, 3, 64], sizes = [2, 13, 8], strides = [1, 1, 1]} : vector<2x16x128xf32> to vector<2x13x8xf32>
    %30 = arith.addf %28, %29 : vector<2x13x8xf32>
    %cst_10 = arith.constant dense<0xFF800000> : vector<2x8xf32>
    %31 = vector.multi_reduction <maximumf>, %30, %cst_10 [1] : vector<2x13x8xf32> to vector<2x8xf32>
    %cst_11 = arith.constant 0.000000e+00 : f32
    %32 = vector.broadcast %cst_11 : f32 to vector<2x104xf32>
    %33 = tpu.concatenate %17, %23, %31, %32 in 1 : vector<2x8xf32>, vector<2x8xf32>, vector<2x8xf32>, vector<2x104xf32> -> vector<2x128xf32>
    %c0_12 = arith.constant 0 : index
    %c0_13 = arith.constant 0 : index
    %34 = vector.load %arg3[%c0_12, %c0_13] : memref<1x128xf32, #tpu.memory_space<vmem>>, vector<1x128xf32>
    %35 = vector.broadcast %34 : vector<1x128xf32> to vector<2x128xf32>
    %36 = arith.addf %33, %35 : vector<2x128xf32>
    %cst_14 = arith.constant 0.000000e+00 : f32
    %37 = vector.broadcast %cst_14 : f32 to vector<2x128xf32>
    %38 = arith.maximumf %36, %37 : vector<2x128xf32>
    %cst_15 = arith.constant 0.000000e+00 : f32
    %39 = vector.broadcast %cst_15 : f32 to vector<6x128xf32>
    %40 = tpu.concatenate %38, %39 in 0 : vector<2x128xf32>, vector<6x128xf32> -> vector<8x128xf32>
    %41 = arith.truncf %40 : vector<8x128xf32> to vector<8x128xbf16>
    %c0_16 = arith.constant 0 : index
    %c0_17 = arith.constant 0 : index
    %42 = vector.load %arg4[%c0_16, %c0_17] : memref<128x128xbf16, #tpu.memory_space<vmem>>, vector<128x128xbf16>
    %cst_18 = arith.constant dense<0.000000e+00> : vector<8x128xf32>
    %43 = tpu.matmul %41, %42, %cst_18 {dimension_numbers = #tpu.dot_dimension_numbers<[1], [0], [0], [1], [0, 0, 1, 1], [], []>} : vector<8x128xbf16>, vector<128x128xbf16>, vector<8x128xf32> -> vector<8x128xf32>
    %c0_19 = arith.constant 0 : index
    %c0_20 = arith.constant 0 : index
    %44 = vector.load %arg5[%c0_19, %c0_20] : memref<1x128xf32, #tpu.memory_space<vmem>>, vector<1x128xf32>
    %45 = vector.broadcast %44 : vector<1x128xf32> to vector<8x128xf32>
    %46 = arith.addf %43, %45 : vector<8x128xf32>
    %c0_21 = arith.constant 0 : index
    %c0_22 = arith.constant 0 : index
    %47 = vector.load %arg6[%c0_21, %c0_22] : memref<8x128xf32, #tpu.memory_space<vmem>>, vector<8x128xf32>
    tpu.vector_store %arg6[%c0_21, %c0_22], %46 {strides = array<i32>} : memref<8x128xf32, #tpu.memory_space<vmem>>, vector<8x128xf32>,
    return
  }
}

</mosaic_0001>

<bundles_post_ra>
// kernel: bert_cnn_forward.1
= control target key start
LH: loop header
LB: loop body
LE: loop exit
PB: predicated region body
PF: predicated region fallthrough
CT: control target
= control target key end

     0   :  { %11 = vsyncpa [#allocation3], 0  ;;  %s5944_s0 = inlined_call_operand.vmem [shape: s32[32,1], index: 0, kind: input, shape index: {}]   ;;  %s5945_s1 = inlined_call_operand.hbm [shape: bf16[1024,768], index: 1, kind: input, shape index: {}]   ;;  %s5946_s2 = inlined_call_operand.hbm [shape: bf16[768,128], index: 2, kind: input, shape index: {}]   ;;  %s5947_s3 = inlined_call_operand.hbm [shape: f32[1,128], index: 3, kind: input, shape index: {}]   ;;  %s5948_s4 = inlined_call_operand.hbm [shape: bf16[128,128], index: 4, kind: input, shape index: {}]   ;;  %s5949_s5 = inlined_call_operand.hbm [shape: f32[1,128], index: 5, kind: input, shape index: {}]   ;;  %s5950_s6 = inlined_call_operand.vmem [shape: f32[8,128], index: 6, kind: output, shape index: {}]  }
   0x1   :  { %12 = vsyncpa [#allocation5], 0 }
   0x2   :  { %13 = vsyncpa [#allocation8], 0  ;;  %s5454_s21 = smov [#allocation4]   ;;  %s5338_s25 = scalar_lea.hbm %s5946_s2, 6144 }
   0x3   :  { %s33_s22 = sshll.u32 %s5454_s21, 4  ;;  %p5339_p0 = scmp.ne.s32.totalorder %s5946_s2, %s5338_s25  ;;  %s34_s22 = int_to_ptr.vmem [resolvable:$true] %s33_s22 }
   0x4   :  { %p5342_p1 = scmp.lt.u32.totalorder %s5338_s25, %s5946_s2 }
   0x6   :  { %p5344_p2 = pnand %p5342_p1, %p5339_p0 }
   0x8   :  { %5347 = shalt.err (!%p5344_p2)
}
   0x9   :  { %s5348_s30 = scalar_lea.vmem %s34_s22, 6144  ;;  %p5353_p4 = scmp.lt.s32.totalorder %s34_s22, %s34_s22 }
   0xa   :  { %p5349_p3 = scmp.ne.s32.totalorder %s34_s22, %s5348_s30  ;;  %p5354_p5 = scmp.lt.s32.totalorder %s5348_s30, %s5348_s30 }
   0xc   :  { %p5355_p6 = por %p5354_p5, %p5353_p4 }
   0xe   :  { %p5356_p7 = pnand %p5355_p6, %p5349_p3 }
  0x10   :  { %5359 = shalt.err (!%p5356_p7)
}
  0x11   :  { %s5455_s7 = smov 64   ;;  %s5456_s8 = smov 4  }
  0x12   :  { %39 = dma.hbm_to_vmem [thread:$0]  %s5946_s2, 6144, %s34_s22, [#allocation5], %s5455_s7, %s5455_s7, %s5456_s8  }
  0x13   :  { %s5457_s11 = smov [#allocation7]   ;;  %s5458_s13 = smov [#allocation2]  }
  0x14   :  { %s55_s12 = sshll.u32 %s5457_s11, 4  ;;  %s21_s14 = sshll.u32 %s5458_s13, 4  ;;  %s56_s12 = int_to_ptr.vmem [resolvable:$true] %s55_s12  ;;  %s22_s14 = int_to_ptr.vmem [resolvable:$true] %s21_s14 }
  0x15   :  { %s5360_s17 = scalar_lea.hbm %s5948_s4, 1024 }
  0x16   :  { %p5361_p8 = scmp.ne.s32.totalorder %s5948_s4, %s5360_s17  ;;  %p5364_p9 = scmp.lt.u32.totalorder %s5360_s17, %s5948_s4 }
  0x18   :  { %p5366_p10 = pnand %p5364_p9, %p5361_p8 }
  0x1a   :  { %5369 = shalt.err (!%p5366_p10)
}
  0x1b   :  { %s5370_s2 = scalar_lea.vmem %s56_s12, 1024  ;;  %p5375_p12 = scmp.lt.s32.totalorder %s56_s12, %s56_s12 }
  0x1c   :  { %p5371_p11 = scmp.ne.s32.totalorder %s56_s12, %s5370_s2  ;;  %p5376_p13 = scmp.lt.s32.totalorder %s5370_s2, %s5370_s2 }
  0x1e   :  { %p5377_p0 = por %p5376_p13, %p5375_p12 }
  0x20   :  { %p5378_p1 = pnand %p5377_p0, %p5371_p11 }
  0x22   :  { %5381 = shalt.err (!%p5378_p1)
}
  0x23   :  { %61 = dma.hbm_to_vmem [thread:$0]  %s5948_s4, 1024, %s56_s12, [#allocation8], %s5455_s7, %s5455_s7, %s5456_s8  }
  0x24   :  { %s5382_s26 = scalar_lea.hbm %s5945_s1, 49152 }
  0x25   :  { %p5383_p2 = scmp.ne.s32.totalorder %s5945_s1, %s5382_s26  ;;  %p5386_p3 = scmp.lt.u32.totalorder %s5382_s26, %s5945_s1 }
  0x27   :  { %p5388_p4 = pnand %p5386_p3, %p5383_p2 }
  0x29   :  { %5391 = shalt.err (!%p5388_p4)
}
  0x2a   :  { %s5392_s9 = scalar_lea.vmem %s22_s14, 49152  ;;  %p5397_p6 = scmp.lt.s32.totalorder %s22_s14, %s22_s14 }
  0x2b   :  { %p5393_p5 = scmp.ne.s32.totalorder %s22_s14, %s5392_s9  ;;  %p5398_p7 = scmp.lt.s32.totalorder %s5392_s9, %s5392_s9 }
  0x2d   :  { %p5399_p8 = por %p5398_p7, %p5397_p6 }
  0x2f   :  { %p5400_p9 = pnand %p5399_p8, %p5393_p5 }
  0x31   :  { %5403 = shalt.err (!%p5400_p9)
}
  0x32   :  { %s5459_s4 = smov 384   ;;  %s5460_s7 = smov 24  }
  0x33   :  { %27 = dma.hbm_to_vmem [thread:$0]  %s5945_s1, 49152, %s22_s14, [#allocation3], %s5459_s4, %s5459_s4, %s5460_s7  }
  0x34   :  { %s5461_s11 = smov [#allocation6]   ;;  %s5462_s13 = smov [#allocation9]  }
  0x35   :  { %s46_s12 = sshll.u32 %s5461_s11, 4  ;;  %s68_s15 = sshll.u32 %s5462_s13, 4  ;;  %s47_s12 = int_to_ptr.vmem [resolvable:$true] %s46_s12  ;;  %s69_s15 = int_to_ptr.vmem [resolvable:$true] %s68_s15 }
  0x36   :  { %s5404_s18 = scalar_lea.hbm %s5947_s3, 16 }
  0x37   :  { %p5405_p10 = scmp.ne.s32.totalorder %s5947_s3, %s5404_s18  ;;  %p5408_p11 = scmp.lt.u32.totalorder %s5404_s18, %s5947_s3 }
  0x39   :  { %p5410_p12 = pnand %p5408_p11, %p5405_p10 }
  0x3b   :  { %5413 = shalt.err (!%p5410_p12)
}
  0x3c   :  { %s5414_s1 = scalar_lea.vmem %s47_s12, 16  ;;  %s5418_s14 = scalar_lea.vmem %s47_s12, 32 }
  0x3d   :  { %p5415_p13 = scmp.ne.s32.totalorder %s47_s12, %s5414_s1  ;;  %p5419_p0 = scmp.lt.s32.totalorder %s47_s12, %s47_s12 }
  0x3e   :  { %p5420_p1 = scmp.lt.s32.totalorder %s5418_s14, %s5414_s1 }
  0x40   :  { %p5421_p2 = por %p5420_p1, %p5419_p0 }
  0x42   :  { %p5422_p3 = pnand %p5421_p2, %p5415_p13 }
  0x44   :  { %5425 = shalt.err (!%p5422_p3)
}
  0x45   :  { %49 = dma.hbm_to_vmem [thread:$0]  %s5947_s3, 16, %s47_s12, [#allocation5]  }
  0x46   :  { %s5426_s26 = scalar_lea.hbm %s5949_s5, 16 }
  0x47   :  { %p5427_p4 = scmp.ne.s32.totalorder %s5949_s5, %s5426_s26  ;;  %p5430_p5 = scmp.lt.u32.totalorder %s5426_s26, %s5949_s5 }
  0x49   :  { %p5432_p6 = pnand %p5430_p5, %p5427_p4 }
  0x4b   :  { %5435 = shalt.err (!%p5432_p6)
}
  0x4c   :  { %s5436_s9 = scalar_lea.vmem %s69_s15, 16  ;;  %s5440_s4 = scalar_lea.vmem %s69_s15, 32 }
  0x4d   :  { %p5437_p7 = scmp.ne.s32.totalorder %s69_s15, %s5436_s9  ;;  %p5441_p8 = scmp.lt.s32.totalorder %s69_s15, %s69_s15 }
  0x4e   :  { %p5442_p9 = scmp.lt.s32.totalorder %s5440_s4, %s5436_s9 }
  0x50   :  { %p5443_p10 = por %p5442_p9, %p5441_p8 }
  0x52   :  { %p5444_p11 = pnand %p5443_p10, %p5437_p7 }
  0x54   :  { %5447 = shalt.err (!%p5444_p11)
}
  0x55   :  { %71 = dma.hbm_to_vmem [thread:$0]  %s5949_s5, 16, %s69_s15, [#allocation8]  }
  0x56   :  { %5448 = dma.done.wait [#allocation3], 49152  }
  0x57   :  { %5449 = vsyncadd [#allocation3], 4294918144 }
  0x58   :  { %5450 = dma.done.wait [#allocation5], 6160  }
  0x59   :  { %5451 = vsyncadd [#allocation5], 4294961136 }
  0x5a   :  { %5452 = dma.done.wait [#allocation8], 1040  }
  0x5b   :  { %5453 = vsyncadd [#allocation8], 4294966256  ;;  %v5463_v0 = vmov 0   ;;  %v88_v1 = vld [vmem:[%s5944_s0] sm:$0xff]  ;;  %v89_v2 = vld [vmem:[%s5944_s0 + $0x8] sm:$0xff]  ;;  %s5466_s17 = smov 112  }
  0x5c   :  { %4704 = vset.pattern.permute.xlu0 %v5463_v0  ;;  %4705 = vset.pattern.permute.xlu1 %v5463_v0  ;;  %v90_v3 = vld [vmem:[%s5944_s0 + $0x10] sm:$0xff]  ;;  %v91_v4 = vld [vmem:[%s5944_s0 + $0x18] sm:$0xff]  ;;  %s5465_s0 = smov 120   ;;  %s5467_s18 = smov 104  }
  0x5d   :  { %102 = vperm.xlu0 %4704, %v88_v1   ;;  %108 = vperm.xlu1 %4705, %v90_v3   ;;  %v4706_v5 = vld [vmem:[#allocation2 + $0x4] ss:$24 sps:$4 sm:$0xff]   ;;  %v4710_v7 = vld [vmem:[#allocation2] ss:$24 sps:$4 sm:$0xff]   ;;  %v4712_v9 = vld [vmem:[#allocation2 + $0x34] ss:$24 sps:$4 sm:$0xff]  }
  0x5e   :  { %v4708_v6 = vld [vmem:[#allocation2 + $0x304] ss:$24 sps:$4 sm:$0xff]   ;;  %v4711_v8 = vld [vmem:[#allocation2 + $0x300] ss:$24 sps:$4 sm:$0xff]   ;;  %2497 = vmatprep.subr.bf16.mxu1 %v4706_v5  ;;  %v4714_v10 = vld [vmem:[#allocation2 + $0x334] ss:$24 sps:$4 sm:$0xff]  }
  0x5f   :  { %2550 = vmatprep.subr.bf16.mxu0 %v4708_v6  ;;  %2498 = vmatpush1.bf16.msra.mxu1 %v4710_v7  ;;  %v4716_v11 = vld [vmem:[#allocation2 + $0x30] ss:$24 sps:$4 sm:$0xff]   ;;  %v4718_v13 = vld [vmem:[#allocation2 + $0x64] ss:$24 sps:$4 sm:$0xff]   ;;  %v4722_v15 = vld [vmem:[#allocation2 + $0x60] ss:$24 sps:$4 sm:$0xff]   ;;  %v92_v7 = vlaneseq }
  0x60   :  { %v4717_v12 = vld [vmem:[#allocation2 + $0x330] ss:$24 sps:$4 sm:$0xff]   ;;  %2551 = vmatpush1.bf16.msra.mxu0 %v4711_v8  ;;  %2499 = vmatprep.subr.bf16.mxu1 %v4712_v9  ;;  %v4720_v14 = vld [vmem:[#allocation2 + $0x364] ss:$24 sps:$4 sm:$0xff]   ;;  %v4723_v16 = vld [vmem:[#allocation2 + $0x360] ss:$24 sps:$4 sm:$0xff]  }
  0x61   :  { %105 = vperm.xlu0 %4704, %v89_v2   ;;  %111 = vperm.xlu1 %4705, %v91_v4   ;;  %v4724_v17 = vld [vmem:[#allocation2 + $0x94] ss:$24 sps:$4 sm:$0xff]   ;;  %v4728_v19 = vld [vmem:[#allocation2 + $0x90] ss:$24 sps:$4 sm:$0xff]   ;;  %v4730_v21 = vld [vmem:[#allocation2 + $0xc4] ss:$24 sps:$4 sm:$0xff]  }
  0x62   :  { %2552 = vmatprep.subr.bf16.mxu0 %v4714_v10  ;;  %v4726_v18 = vld [vmem:[#allocation2 + $0x394] ss:$24 sps:$4 sm:$0xff]   ;;  %v4729_v20 = vld [vmem:[#allocation2 + $0x390] ss:$24 sps:$4 sm:$0xff]   ;;  %v4732_v22 = vld [vmem:[#allocation2 + $0x3c4] ss:$24 sps:$4 sm:$0xff]  }
  0x63   :  { %2500 = vmatpush1.bf16.msra.mxu1 %v4716_v11  ;;  %v4734_v23 = vld [vmem:[#allocation2 + $0xc0] ss:$24 sps:$4 sm:$0xff]   ;;  %v4736_v25 = vld [vmem:[#allocation2 + $0xf4] ss:$24 sps:$4 sm:$0xff]   ;;  %v4740_v27 = vld [vmem:[#allocation2 + $0xf0] ss:$24 sps:$4 sm:$0xff]  }
  0x64   :  { %2553 = vmatpush1.bf16.msra.mxu0 %v4717_v12  ;;  %2501 = vmatprep.subr.bf16.mxu1 %v4718_v13  ;;  %v4735_v24 = vld [vmem:[#allocation2 + $0x3c0] ss:$24 sps:$4 sm:$0xff]   ;;  %v4738_v26 = vld [vmem:[#allocation2 + $0x3f4] ss:$24 sps:$4 sm:$0xff]   ;;  %v4741_v28 = vld [vmem:[#allocation2 + $0x3f0] ss:$24 sps:$4 sm:$0xff]  }
  0x65   :  { %2554 = vmatprep.subr.bf16.mxu0 %v4720_v14  ;;  %v4742_v29 = vld [vmem:[#allocation2 + $0x124] ss:$24 sps:$4 sm:$0xff]   ;;  %v4746_v31 = vld [vmem:[#allocation2 + $0x120] ss:$24 sps:$4 sm:$0xff]   ;;  %v4748_v33 = vld [vmem:[#allocation2 + $0x154] ss:$24 sps:$4 sm:$0xff]  }
  0x66   :  { %v4744_v30 = vld [vmem:[#allocation2 + $0x424] ss:$24 sps:$4 sm:$0xff]   ;;  %v4747_v32 = vld [vmem:[#allocation2 + $0x420] ss:$24 sps:$4 sm:$0xff]   ;;  %v4750_v34 = vld [vmem:[#allocation2 + $0x454] ss:$24 sps:$4 sm:$0xff]  }
  0x67   :  { %2502 = vmatpush1.bf16.msra.mxu1 %v4722_v15  ;;  %v4752_v35 = vld [vmem:[#allocation2 + $0x150] ss:$24 sps:$4 sm:$0xff]   ;;  %v4754_v37 = vld [vmem:[#allocation2 + $0x184] ss:$24 sps:$4 sm:$0xff]   ;;  %v4758_v39 = vld [vmem:[#allocation2 + $0x180] ss:$24 sps:$4 sm:$0xff]  }
  0x68   :  { %2555 = vmatpush1.bf16.msra.mxu0 %v4723_v16  ;;  %2503 = vmatprep.subr.bf16.mxu1 %v4724_v17  ;;  %v4753_v36 = vld [vmem:[#allocation2 + $0x450] ss:$24 sps:$4 sm:$0xff]   ;;  %v4756_v38 = vld [vmem:[#allocation2 + $0x484] ss:$24 sps:$4 sm:$0xff]   ;;  %v4759_v40 = vld [vmem:[#allocation2 + $0x480] ss:$24 sps:$4 sm:$0xff]  }
  0x69   :  { %2556 = vmatprep.subr.bf16.mxu0 %v4726_v18  ;;  %v4760_v41 = vld [vmem:[#allocation2 + $0x1b4] ss:$24 sps:$4 sm:$0xff]   ;;  %v4764_v43 = vld [vmem:[#allocation2 + $0x1b0] ss:$24 sps:$4 sm:$0xff]   ;;  %v4766_v45 = vld [vmem:[#allocation2 + $0x1e4] ss:$24 sps:$4 sm:$0xff]  }
  0x6a   :  { %v4762_v42 = vld [vmem:[#allocation2 + $0x4b4] ss:$24 sps:$4 sm:$0xff]   ;;  %v4765_v44 = vld [vmem:[#allocation2 + $0x4b0] ss:$24 sps:$4 sm:$0xff]   ;;  %v4768_v46 = vld [vmem:[#allocation2 + $0x4e4] ss:$24 sps:$4 sm:$0xff]  }
  0x6b   :  { %2504 = vmatpush1.bf16.msra.mxu1 %v4728_v19  ;;  %v4770_v47 = vld [vmem:[#allocation2 + $0x1e0] ss:$24 sps:$4 sm:$0xff]   ;;  %v4772_v49 = vld [vmem:[#allocation2 + $0x214] ss:$24 sps:$4 sm:$0xff]   ;;  %v4776_v51 = vld [vmem:[#allocation2 + $0x210] ss:$24 sps:$4 sm:$0xff]  }
  0x6c   :  { %2557 = vmatpush1.bf16.msra.mxu0 %v4729_v20  ;;  %2505 = vmatprep.subr.bf16.mxu1 %v4730_v21  ;;  %v4771_v48 = vld [vmem:[#allocation2 + $0x4e0] ss:$24 sps:$4 sm:$0xff]   ;;  %v4774_v50 = vld [vmem:[#allocation2 + $0x514] ss:$24 sps:$4 sm:$0xff]   ;;  %v4777_v52 = vld [vmem:[#allocation2 + $0x510] ss:$24 sps:$4 sm:$0xff]  }
  0x6d   :  { %2558 = vmatprep.subr.bf16.mxu0 %v4732_v22  ;;  %v4778_v53 = vld [vmem:[#allocation2 + $0x244] ss:$24 sps:$4 sm:$0xff]   ;;  %v4782_v55 = vld [vmem:[#allocation2 + $0x240] ss:$24 sps:$4 sm:$0xff]   ;;  %v4784_v57 = vld [vmem:[#allocation2 + $0x274] ss:$24 sps:$4 sm:$0xff]  }
  0x6e   :  { %v4780_v54 = vld [vmem:[#allocation2 + $0x544] ss:$24 sps:$4 sm:$0xff]   ;;  %v4783_v56 = vld [vmem:[#allocation2 + $0x540] ss:$24 sps:$4 sm:$0xff]   ;;  %v4786_v58 = vld [vmem:[#allocation2 + $0x574] ss:$24 sps:$4 sm:$0xff]  }
  0x6f   :  { %2506 = vmatpush1.bf16.msra.mxu1 %v4734_v23  ;;  %v4788_v59 = vld [vmem:[#allocation2 + $0x270] ss:$24 sps:$4 sm:$0xff]   ;;  %v4790_v61 = vld [vmem:[#allocation2 + $0x2a4] ss:$24 sps:$4 sm:$0xff]   ;;  %v4794_v63 = vld [vmem:[#allocation2 + $0x2a0] ss:$24 sps:$4 sm:$0xff]  }
  0x70   :  { %2559 = vmatpush1.bf16.msra.mxu0 %v4735_v24  ;;  %2507 = vmatprep.subr.bf16.mxu1 %v4736_v25  ;;  %v4789_v60 = vld [vmem:[#allocation2 + $0x570] ss:$24 sps:$4 sm:$0xff]   ;;  %v4792_v62 = vld [vmem:[#allocation2 + $0x5a4] ss:$24 sps:$4 sm:$0xff]   ;;  %v4795_v0 = vld [vmem:[#allocation2 + $0x5a0] ss:$24 sps:$4 sm:$0xff]  }
  0x71   :  { %2560 = vmatprep.subr.bf16.mxu0 %v4738_v26  ;;  %v4796_v1 = vld [vmem:[#allocation2 + $0x2d4] ss:$24 sps:$4 sm:$0xff]   ;;  %v4800_v3 = vld [vmem:[#allocation2 + $0x2d0] ss:$24 sps:$4 sm:$0xff]   ;;  %v4804_v6 = vld [vmem:[#allocation2 + $0x604] ss:$24 sps:$4 sm:$0xff]  }
  0x72   :  { %v4798_v2 = vld [vmem:[#allocation2 + $0x5d4] ss:$24 sps:$4 sm:$0xff]   ;;  %v4801_v4 = vld [vmem:[#allocation2 + $0x5d0] ss:$24 sps:$4 sm:$0xff]   ;;  %v5577_v8 = vand.u32 127, %v92_v7  ;;  %v5957_v22 = vmov 0 }
  0x73   :  { %2508 = vmatpush1.bf16.msra.mxu1 %v4740_v27  ;;  %v4807_v5 = vld [vmem:[#allocation2 + $0xc] ss:$24 sps:$4 sm:$0xff]   ;;  %v4805_v14 = vld [vmem:[#allocation2 + $0x8] ss:$24 sps:$4 sm:$0xff]   ;;  %v4813_v18 = vld [vmem:[#allocation2 + $0x3c] ss:$24 sps:$4 sm:$0xff]  }
  0x74   :  { %2561 = vmatpush1.bf16.msra.mxu0 %v4741_v28  ;;  %2509 = vmatprep.subr.bf16.mxu1 %v4742_v29  ;;  %v94_v11 = vadd.s32 128, %v5577_v8  ;;  %v96_v12 = vadd.s32 384, %v5577_v8  ;;  %v95_v15 = vadd.s32 256, %v5577_v8  ;;  %v4802_v17 = vld [vmem:[#allocation2 + $0x600] ss:$24 sps:$4 sm:$0xff]   ;;  %v5963_v26 = vmov 0 }
  0x75   :  { %2562 = vmatprep.subr.bf16.mxu0 %v4744_v30  ;;  %v4810_v20 = vld [vmem:[#allocation2 + $0x634] ss:$24 sps:$4 sm:$0xff]   ;;  %v5464_v21 = vmov 1.0|1.0   ;;  %v4811_v24 = vld [vmem:[#allocation2 + $0x38] ss:$24 sps:$4 sm:$0xff]  }
  0x76   :  { %v4808_v27 = vld [vmem:[#allocation2 + $0x630] ss:$24 sps:$4 sm:$0xff]   ;;  %v4819_v29 = vld [vmem:[#allocation2 + $0x6c] ss:$24 sps:$4 sm:$0xff]   ;;  %v5249_v28 = vld [vmem:[#allocation4 + $0x58] sm:$0xff]  }
  0x77   :  { %2510 = vmatpush1.bf16.msra.mxu1 %v4746_v31  ;;  %v4816_v30 = vld [vmem:[#allocation2 + $0x664] ss:$24 sps:$4 sm:$0xff]   ;;  %v4814_v31 = vld [vmem:[#allocation2 + $0x660] ss:$24 sps:$4 sm:$0xff]   ;;  %v4868_v7 = vld [vmem:[#allocation2 + $0x810] ss:$24 sps:$4 sm:$0xff]  }
  0x78   :  { %2563 = vmatpush1.bf16.msra.mxu0 %v4747_v32  ;;  %2511 = vmatprep.subr.bf16.mxu1 %v4748_v33  ;;  %v5655_v32 = vadd.s32 640, %v5577_v8  ;;  %v4817_v33 = vld [vmem:[#allocation2 + $0x68] ss:$24 sps:$4 sm:$0xff]   ;;  %v5029_v19 = vld [vmem:[#allocation2 + $0x104] ss:$24 sps:$4 sm:$0xff]  }
  0x79   :  { %2564 = vmatprep.subr.bf16.mxu0 %v4750_v34  ;;  %v5105_v23 = vld [vmem:[#allocation2 + $0x370] ss:$24 sps:$4 sm:$0xff]   ;;  %v5197_v25 = vld [vmem:[#allocation2 + $0x6a4] ss:$24 sps:$4 sm:$0xff]  }
  0x7a   :  { %v5117_v34 = vld [vmem:[#allocation2 + $0x3d0] ss:$24 sps:$4 sm:$0xff]  }
  0x7b   :  { %2512 = vmatpush1.bf16.msra.mxu1 %v4752_v35  ;;  %v4822_v35 = vld [vmem:[#allocation2 + $0x694] ss:$24 sps:$4 sm:$0xff]  }
  0x7c   :  { %2565 = vmatpush1.bf16.msra.mxu0 %v4753_v36  ;;  %2513 = vmatprep.subr.bf16.mxu1 %v4754_v37  ;;  %v4823_v37 = vld [vmem:[#allocation2 + $0x98] ss:$24 sps:$4 sm:$0xff]   ;;  %v5259_v36 = vld [vmem:[#allocation4 + $0x68] sm:$0xff]  }
  0x7d   :  { %2566 = vmatprep.subr.bf16.mxu0 %v4756_v38  ;;  %v4825_v38 = vld [vmem:[#allocation2 + $0x9c] ss:$24 sps:$4 sm:$0xff]  }
  0x7f   :  { %2514 = vmatpush1.bf16.msra.mxu1 %v4758_v39  ;;  %v5206_v39 = vld [vmem:[#allocation2 + $0x734] ss:$24 sps:$4 sm:$0xff]  }
  0x80   :  { %2567 = vmatpush1.bf16.msra.mxu0 %v4759_v40  ;;  %2515 = vmatprep.subr.bf16.mxu1 %v4760_v41  ;;  %v4820_v40 = vld [vmem:[#allocation2 + $0x690] ss:$24 sps:$4 sm:$0xff]   ;;  %v4831_v41 = vld [vmem:[#allocation2 + $0xcc] ss:$24 sps:$4 sm:$0xff]  }
  0x81   :  { %2568 = vmatprep.subr.bf16.mxu0 %v4762_v42  ;;  %v4828_v42 = vld [vmem:[#allocation2 + $0x6c4] ss:$24 sps:$4 sm:$0xff]  }
  0x83   :  { %2516 = vmatpush1.bf16.msra.mxu1 %v4764_v43  ;;  %v4826_v43 = vld [vmem:[#allocation2 + $0x6c0] ss:$24 sps:$4 sm:$0xff]  }
  0x84   :  { %2569 = vmatpush1.bf16.msra.mxu0 %v4765_v44  ;;  %2517 = vmatprep.subr.bf16.mxu1 %v4766_v45  ;;  %v4829_v44 = vld [vmem:[#allocation2 + $0xc8] ss:$24 sps:$4 sm:$0xff]   ;;  %v4834_v45 = vld [vmem:[#allocation2 + $0x6f4] ss:$24 sps:$4 sm:$0xff]  }
  0x85   :  { %2570 = vmatprep.subr.bf16.mxu0 %v4768_v46  ;;  %v4837_v46 = vld [vmem:[#allocation2 + $0xfc] ss:$24 sps:$4 sm:$0xff]  }
  0x87   :  { %2518 = vmatpush1.bf16.msra.mxu1 %v4770_v47  ;;  %v4832_v47 = vld [vmem:[#allocation2 + $0x6f0] ss:$24 sps:$4 sm:$0xff]  }
  0x88   :  { %2571 = vmatpush1.bf16.msra.mxu0 %v4771_v48  ;;  %2519 = vmatprep.subr.bf16.mxu1 %v4772_v49  ;;  %v4835_v48 = vld [vmem:[#allocation2 + $0xf8] ss:$24 sps:$4 sm:$0xff]   ;;  %v4840_v49 = vld [vmem:[#allocation2 + $0x724] ss:$24 sps:$4 sm:$0xff]  }
  0x89   :  { %2572 = vmatprep.subr.bf16.mxu0 %v4774_v50  ;;  %v4843_v50 = vld [vmem:[#allocation2 + $0x12c] ss:$24 sps:$4 sm:$0xff]  }
  0x8b   :  { %2520 = vmatpush1.bf16.msra.mxu1 %v4776_v51  ;;  %v4838_v51 = vld [vmem:[#allocation2 + $0x720] ss:$24 sps:$4 sm:$0xff]  }
  0x8c   :  { %2573 = vmatpush1.bf16.msra.mxu0 %v4777_v52  ;;  %2521 = vmatprep.subr.bf16.mxu1 %v4778_v53  ;;  %v4841_v52 = vld [vmem:[#allocation2 + $0x128] ss:$24 sps:$4 sm:$0xff]   ;;  %v4846_v53 = vld [vmem:[#allocation2 + $0x754] ss:$24 sps:$4 sm:$0xff]  }
  0x8d   :  { %2574 = vmatprep.subr.bf16.mxu0 %v4780_v54  ;;  %v4849_v54 = vld [vmem:[#allocation2 + $0x15c] ss:$24 sps:$4 sm:$0xff]  }
  0x8f   :  { %2522 = vmatpush1.bf16.msra.mxu1 %v4782_v55  ;;  %v4844_v55 = vld [vmem:[#allocation2 + $0x750] ss:$24 sps:$4 sm:$0xff]  }
  0x90   :  { %2575 = vmatpush1.bf16.msra.mxu0 %v4783_v56  ;;  %2523 = vmatprep.subr.bf16.mxu1 %v4784_v57  ;;  %v4847_v56 = vld [vmem:[#allocation2 + $0x158] ss:$24 sps:$4 sm:$0xff]   ;;  %v4852_v57 = vld [vmem:[#allocation2 + $0x784] ss:$24 sps:$4 sm:$0xff]  }
  0x91   :  { %2576 = vmatprep.subr.bf16.mxu0 %v4786_v58  ;;  %v4855_v58 = vld [vmem:[#allocation2 + $0x18c] ss:$24 sps:$4 sm:$0xff]  }
  0x93   :  { %2524 = vmatpush1.bf16.msra.mxu1 %v4788_v59  ;;  %v4850_v59 = vld [vmem:[#allocation2 + $0x780] ss:$24 sps:$4 sm:$0xff]  }
  0x94   :  { %2577 = vmatpush1.bf16.msra.mxu0 %v4789_v60  ;;  %2525 = vmatprep.subr.bf16.mxu1 %v4790_v61  ;;  %v4853_v60 = vld [vmem:[#allocation2 + $0x188] ss:$24 sps:$4 sm:$0xff]   ;;  %v4858_v61 = vld [vmem:[#allocation2 + $0x7b4] ss:$24 sps:$4 sm:$0xff]  }
  0x95   :  { %2578 = vmatprep.subr.bf16.mxu0 %v4792_v62  ;;  %v4861_v62 = vld [vmem:[#allocation2 + $0x1bc] ss:$24 sps:$4 sm:$0xff]  }
  0x97   :  { %2526 = vmatpush1.bf16.msra.mxu1 %v4794_v63  ;;  %v4856_v63 = vld [vmem:[#allocation2 + $0x7b0] ss:$24 sps:$4 sm:$0xff]  }
  0x98   :  { %2579 = vmatpush1.bf16.msra.mxu0 %v4795_v0  ;;  %2527 = vmatprep.subr.bf16.mxu1 %v4796_v1  ;;  %v4859_v0 = vld [vmem:[#allocation2 + $0x1b8] ss:$24 sps:$4 sm:$0xff]   ;;  %v4864_v1 = vld [vmem:[#allocation2 + $0x7e4] ss:$24 sps:$4 sm:$0xff]  }
  0x99   :  { %2580 = vmatprep.subr.bf16.mxu0 %v4798_v2  ;;  %v4867_v2 = vld [vmem:[#allocation2 + $0x1ec] ss:$24 sps:$4 sm:$0xff]  }
  0x9b   :  { %2528 = vmatpush1.bf16.msra.mxu1 %v4800_v3  ;;  %v4862_v3 = vld [vmem:[#allocation2 + $0x7e0] ss:$24 sps:$4 sm:$0xff]  }
  0x9c   :  { %2581 = vmatpush1.bf16.msra.mxu0 %v4801_v4  ;;  %2709 = vmatprep.subr.bf16.mxu1 %v4807_v5  ;;  %v4865_v4 = vld [vmem:[#allocation2 + $0x1e8] ss:$24 sps:$4 sm:$0xff]   ;;  %v4870_v5 = vld [vmem:[#allocation2 + $0x814] ss:$24 sps:$4 sm:$0xff]  }
  0x9d   :  { %2603 = vmatprep.subr.bf16.mxu0 %v4804_v6  ;;  %v4873_v6 = vld [vmem:[#allocation2 + $0x21c] ss:$24 sps:$4 sm:$0xff]  }
  0xdc   :  { %v5579_v9 = vpop.permute.xlu0 %102  ;;  %v5581_v10 = vpop.permute.xlu1 %108 }
  0xdd   :  { %vm114_vm0 = vcmp.eq.s32.totalorder %v94_v11, %v5579_v9  ;;  %vm116_vm5 = vcmp.eq.s32.totalorder %v96_v12, %v5579_v9  ;;  %vm113_vm8 = vcmp.eq.s32.totalorder %v5577_v8, %v5579_v9  ;;  %vm130_vm9 = vcmp.eq.s32.totalorder %v94_v11, %v5581_v10 }
  0xde   :  { %vm115_vm12 = vcmp.eq.s32.totalorder %v95_v15, %v5579_v9  ;;  %vm132_vm13 = vcmp.eq.s32.totalorder %v96_v12, %v5581_v10 }
  0xe0   :  { %v5585_v13 = vpop.permute.xlu0 %105  ;;  %v5588_v16 = vpop.permute.xlu1 %111 }
  0xe1   :  { %vm122_vm1 = vcmp.eq.s32.totalorder %v94_v11, %v5585_v13  ;;  %vm124_vm2 = vcmp.eq.s32.totalorder %v96_v12, %v5585_v13  ;;  %vm121_vm3 = vcmp.eq.s32.totalorder %v5577_v8, %v5585_v13  ;;  %vm123_vm6 = vcmp.eq.s32.totalorder %v95_v15, %v5585_v13 }
  0xe2   :  { %vm5595_vm4 = vmpackc.low %vm122_vm1, %vm114_vm0  ;;  %vm138_vm10 = vcmp.eq.s32.totalorder %v94_v11, %v5588_v16  ;;  %vm140_vm14 = vcmp.eq.s32.totalorder %v96_v12, %v5588_v16  ;;  %v4871_v11 = vld [vmem:[#allocation2 + $0x218] ss:$24 sps:$4 sm:$0xff]   ;;  %v4876_v12 = vld [vmem:[#allocation2 + $0x844] ss:$24 sps:$4 sm:$0xff]  }
  0xe3   :  { %4347 = vmatprep.mubr.msk.bf16.mxu1 %vm5595_vm4, %v5464_v21  ;;  %vm5604_vm7 = vmpackc.low %vm124_vm2, %vm116_vm5  ;;  %vm129_vm2 = vcmp.eq.s32.totalorder %v5577_v8, %v5581_v10  ;;  %vm131_vm5 = vcmp.eq.s32.totalorder %v95_v15, %v5581_v10 }
  0xe4   :  { %v5958_v22 = vsel %vm5604_vm7, 4294967295, %v5957_v22  ;;  %4355 = vmatprep.mubr.msk.bf16.mxu0 %vm5604_vm7, %v5464_v21  ;;  %vm5615_vm11 = vmpackc.low %vm121_vm3, %vm113_vm8  ;;  %vm137_vm3 = vcmp.eq.s32.totalorder %v5577_v8, %v5588_v16 }
  0xe5   :  { %4349 = vmatmul.mubr.msk.bf16.vlgmr.msra.gmra.mrb[0].mxu1 %vm5615_vm11, %v5464_v21  ;;  %vm5627_vm15 = vmpackc.low %vm123_vm6, %vm115_vm12  ;;  %vm139_vm6 = vcmp.eq.s32.totalorder %v95_v15, %v5588_v16  ;;  %vm118_vm12 = vcmp.eq.s32.totalorder %v5655_v32, %v5579_v9  ;;  %v4874_v15 = vld [vmem:[#allocation2 + $0x840] ss:$24 sps:$4 sm:$0xff]  }
  0xe6   :  { %4357 = vmatmul.mubr.msk.bf16.vlgmr.msra.gmra.mrb[0].mxu0 %vm5627_vm15, %v5464_v21  ;;  %2710 = vmatpush1.bf16.msra.mxu1 %v4805_v14  ;;  %vm5634_vm0 = vmpackc.low %vm138_vm10, %vm130_vm9  ;;  %vm126_vm10 = vcmp.eq.s32.totalorder %v5655_v32, %v5585_v13  ;;  %v4879_v14 = vld [vmem:[#allocation2 + $0x24c] ss:$24 sps:$4 sm:$0xff]  }
  0xe7   :  { %v5964_v26 = vsel %vm5634_vm0, 4294967295, %v5963_v26  ;;  %2604 = vmatpush1.bf16.msra.mxu0 %v4802_v17  ;;  %2711 = vmatprep.subr.bf16.mxu1 %v4813_v18  ;;  %vm5638_vm1 = vmpackc.low %vm140_vm14, %vm132_vm13  ;;  %v4877_v17 = vld [vmem:[#allocation2 + $0x248] ss:$24 sps:$4 sm:$0xff]   ;;  %v4882_v18 = vld [vmem:[#allocation2 + $0x874] ss:$24 sps:$4 sm:$0xff]  }
  0xe8   :  { %2605 = vmatprep.subr.bf16.mxu0 %v4810_v20  ;;  %4351 = vmatprep.mubr.msk.bf16.mxu1 %vm5634_vm0, %v5464_v21  ;;  %vm5657_vm8 = vmpackc.low %vm137_vm3, %vm129_vm2  ;;  %v4885_v20 = vld [vmem:[#allocation2 + $0x27c] ss:$24 sps:$4 sm:$0xff]   ;;  %vm134_vm2 = vcmp.eq.s32.totalorder %v5655_v32, %v5581_v10  ;;  %vm142_vm3 = vcmp.eq.s32.totalorder %v5655_v32, %v5588_v16  ;;  %v5710_v32 = vadd.s32 896, %v5577_v8 }
  0xe9   :  { %4359 = vmatprep.mubr.msk.bf16.mxu0 %vm5638_vm1, %v5464_v21  ;;  %vm5661_vm9 = vmpackc.low %vm139_vm6, %vm131_vm5 }
  0xea   :  { %2712 = vmatpush1.bf16.msra.mxu1 %v4811_v24  ;;  %vm5675_vm13 = vmpackc.low %vm126_vm10, %vm118_vm12  ;;  %v4880_v24 = vld [vmem:[#allocation2 + $0x870] ss:$24 sps:$4 sm:$0xff]  }
  0xeb   :  { %2606 = vmatpush1.bf16.msra.mxu0 %v4808_v27  ;;  %2713 = vmatprep.subr.bf16.mxu1 %v4819_v29  ;;  %v4883_v27 = vld [vmem:[#allocation2 + $0x278] ss:$24 sps:$4 sm:$0xff]   ;;  %v4888_v29 = vld [vmem:[#allocation2 + $0x8a4] ss:$24 sps:$4 sm:$0xff]   ;;  %vm5696_vm10 = vmpackc.low %vm142_vm3, %vm134_vm2  ;;  %vm128_vm2 = vcmp.eq.s32.totalorder %v5710_v32, %v5585_v13 }
  0xec   :  { %2607 = vmatprep.subr.bf16.mxu0 %v4816_v30  ;;  %v4891_v30 = vld [vmem:[#allocation2 + $0x2ac] ss:$24 sps:$4 sm:$0xff]  }
  0xed   :  { %4353 = vmatmul.mubr.msk.bf16.gmra.mrb[4].mxu1 %vm5657_vm8, %v5464_v21 }
  0xee   :  { %4361 = vmatmul.mubr.msk.bf16.gmra.mrb[4].mxu0 %vm5661_vm9, %v5464_v21  ;;  %2714 = vmatpush1.bf16.msra.mxu1 %v4817_v33  ;;  %v4889_v33 = vld [vmem:[#allocation2 + $0x2a8] ss:$24 sps:$4 sm:$0xff]  }
  0xef   :  { %2608 = vmatpush1.bf16.msra.mxu0 %v4814_v31  ;;  %4363 = vmatprep.mubr.msk.bf16.mxu0 %vm5675_vm13, %v5464_v21  ;;  %v4886_v31 = vld [vmem:[#allocation2 + $0x8a0] ss:$24 sps:$4 sm:$0xff]  }
  0xf0   :  { %4379 = vmatprep.mubr.msk.bf16.mxu1 %vm5595_vm4, %v5464_v21  ;;  %2609 = vmatprep.subr.bf16.mxu0 %v4822_v35  ;;  %v4894_v35 = vld [vmem:[#allocation2 + $0x8d4] ss:$24 sps:$4 sm:$0xff]  }
  0xf1   :  { %2715 = vmatprep.subr.bf16.mxu1 %v4825_v38  ;;  %v97_v38 = vadd.s32 512, %v5577_v8 }
  0xf2   :  { %2716 = vmatpush1.bf16.msra.mxu1 %v4823_v37  ;;  %v4897_v37 = vld [vmem:[#allocation2 + $0x2dc] ss:$24 sps:$4 sm:$0xff]  }
  0xf3   :  { %2610 = vmatpush1.bf16.msra.mxu0 %v4820_v40  ;;  %2717 = vmatprep.subr.bf16.mxu1 %v4831_v41  ;;  %v4892_v40 = vld [vmem:[#allocation2 + $0x8d0] ss:$24 sps:$4 sm:$0xff]   ;;  %vm125_vm14 = vcmp.eq.s32.totalorder %v97_v38, %v5585_v13  ;;  %vm117_vm5 = vcmp.eq.s32.totalorder %v97_v38, %v5579_v9  ;;  %vm133_vm12 = vcmp.eq.s32.totalorder %v97_v38, %v5581_v10 }
  0xf4   :  { %2611 = vmatprep.subr.bf16.mxu0 %v4828_v42  ;;  %v4895_v41 = vld [vmem:[#allocation2 + $0x2d8] ss:$24 sps:$4 sm:$0xff]   ;;  %v4900_v42 = vld [vmem:[#allocation2 + $0x904] ss:$24 sps:$4 sm:$0xff]   ;;  %vm5692_vm6 = vmpackc.low %vm125_vm14, %vm117_vm5  ;;  %vm141_vm14 = vcmp.eq.s32.totalorder %v97_v38, %v5588_v16  ;;  %vm120_vm5 = vcmp.eq.s32.totalorder %v5710_v32, %v5579_v9 }
  0xf5   :  { %vm5719_vm3 = vmpackc.low %vm141_vm14, %vm133_vm12  ;;  %v4963_v38 = vld [vmem:[#allocation2 + $0x4ec] ss:$24 sps:$4 sm:$0xff]   ;;  %vm136_vm14 = vcmp.eq.s32.totalorder %v5710_v32, %v5581_v10 }
  0xf6   :  { %2718 = vmatpush1.bf16.msra.mxu1 %v4829_v44  ;;  %v5251_v44 = vld [vmem:[#allocation2 + $0x9a0] ss:$24 sps:$4 sm:$0xff]  }
  0xf7   :  { %2612 = vmatpush1.bf16.msra.mxu0 %v4826_v43  ;;  %2719 = vmatprep.subr.bf16.mxu1 %v4837_v46  ;;  %v4903_v43 = vld [vmem:[#allocation2 + $0x30c] ss:$24 sps:$4 sm:$0xff]   ;;  %v4901_v46 = vld [vmem:[#allocation2 + $0x308] ss:$24 sps:$4 sm:$0xff]  }
  0xf8   :  { %2613 = vmatprep.subr.bf16.mxu0 %v4834_v45  ;;  %v4898_v45 = vld [vmem:[#allocation2 + $0x900] ss:$24 sps:$4 sm:$0xff]  }
  0xfa   :  { %2720 = vmatpush1.bf16.msra.mxu1 %v4835_v48  ;;  %v4906_v48 = vld [vmem:[#allocation2 + $0x934] ss:$24 sps:$4 sm:$0xff]  }
  0xfb   :  { %2614 = vmatpush1.bf16.msra.mxu0 %v4832_v47  ;;  %2721 = vmatprep.subr.bf16.mxu1 %v4843_v50  ;;  %v4904_v50 = vld [vmem:[#allocation2 + $0x930] ss:$24 sps:$4 sm:$0xff]   ;;  %v5258_v47 = vld [vmem:[#allocation2 + $0x9d4] ss:$24 sps:$4 sm:$0xff]  }
  0xfc   :  { %2615 = vmatprep.subr.bf16.mxu0 %v4840_v49  ;;  %v4909_v49 = vld [vmem:[#allocation2 + $0x33c] ss:$24 sps:$4 sm:$0xff]  }
  0xfe   :  { %2722 = vmatpush1.bf16.msra.mxu1 %v4841_v52  ;;  %v4912_v52 = vld [vmem:[#allocation2 + $0x964] ss:$24 sps:$4 sm:$0xff]  }
  0xff   :  { %2616 = vmatpush1.bf16.msra.mxu0 %v4838_v51  ;;  %2723 = vmatprep.subr.bf16.mxu1 %v4849_v54  ;;  %v4907_v51 = vld [vmem:[#allocation2 + $0x338] ss:$24 sps:$4 sm:$0xff]  }
 0x100   :  { %2617 = vmatprep.subr.bf16.mxu0 %v4846_v53  ;;  %v4915_v53 = vld [vmem:[#allocation2 + $0x36c] ss:$24 sps:$4 sm:$0xff]   ;;  %v4910_v54 = vld [vmem:[#allocation2 + $0x960] ss:$24 sps:$4 sm:$0xff]  }
 0x102   :  { %2724 = vmatpush1.bf16.msra.mxu1 %v4847_v56  ;;  %v4913_v56 = vld [vmem:[#allocation2 + $0x368] ss:$24 sps:$4 sm:$0xff]  }
 0x103   :  { %2618 = vmatpush1.bf16.msra.mxu0 %v4844_v55  ;;  %2725 = vmatprep.subr.bf16.mxu1 %v4855_v58  ;;  %v5979_v58 = vmov 0 }
 0x104   :  { %2619 = vmatprep.subr.bf16.mxu0 %v4852_v57  ;;  %v4918_v57 = vld [vmem:[#allocation2 + $0x994] ss:$24 sps:$4 sm:$0xff]  }
 0x106   :  { %2726 = vmatpush1.bf16.msra.mxu1 %v4853_v60  ;;  %v4916_v60 = vld [vmem:[#allocation2 + $0x990] ss:$24 sps:$4 sm:$0xff]  }
 0x107   :  { %2620 = vmatpush1.bf16.msra.mxu0 %v4850_v59  ;;  %2727 = vmatprep.subr.bf16.mxu1 %v4861_v62  ;;  %v4921_v59 = vld [vmem:[#allocation2 + $0x39c] ss:$24 sps:$4 sm:$0xff]  }
 0x108   :  { %2621 = vmatprep.subr.bf16.mxu0 %v4858_v61  ;;  %v4919_v61 = vld [vmem:[#allocation2 + $0x398] ss:$24 sps:$4 sm:$0xff]   ;;  %v4924_v62 = vld [vmem:[#allocation2 + $0x9c4] ss:$24 sps:$4 sm:$0xff]  }
 0x10a   :  { %2728 = vmatpush1.bf16.msra.mxu1 %v4859_v0  ;;  %v4922_v0 = vld [vmem:[#allocation2 + $0x9c0] ss:$24 sps:$4 sm:$0xff]  }
 0x10b   :  { %2622 = vmatpush1.bf16.msra.mxu0 %v4856_v63  ;;  %2729 = vmatprep.subr.bf16.mxu1 %v4867_v2  ;;  %v4927_v63 = vld [vmem:[#allocation2 + $0x3cc] ss:$24 sps:$4 sm:$0xff]  }
 0x10c   :  { %2623 = vmatprep.subr.bf16.mxu0 %v4864_v1  ;;  %v4925_v1 = vld [vmem:[#allocation2 + $0x3c8] ss:$24 sps:$4 sm:$0xff]   ;;  %v4930_v2 = vld [vmem:[#allocation2 + $0x9f4] ss:$24 sps:$4 sm:$0xff]  }
 0x10e   :  { %2730 = vmatpush1.bf16.msra.mxu1 %v4865_v4  ;;  %v4928_v4 = vld [vmem:[#allocation2 + $0x9f0] ss:$24 sps:$4 sm:$0xff]  }
 0x10f   :  { %2624 = vmatpush1.bf16.msra.mxu0 %v4862_v3  ;;  %2731 = vmatprep.subr.bf16.mxu1 %v4873_v6  ;;  %v4933_v3 = vld [vmem:[#allocation2 + $0x3fc] ss:$24 sps:$4 sm:$0xff]  }
 0x110   :  { %2625 = vmatprep.subr.bf16.mxu0 %v4870_v5  ;;  %v4931_v5 = vld [vmem:[#allocation2 + $0x3f8] ss:$24 sps:$4 sm:$0xff]   ;;  %v4936_v6 = vld [vmem:[#allocation2 + $0xa24] ss:$24 sps:$4 sm:$0xff]  }
 0x112   :  { %2732 = vmatpush1.bf16.msra.mxu1 %v4871_v11  ;;  %v4934_v11 = vld [vmem:[#allocation2 + $0xa20] ss:$24 sps:$4 sm:$0xff]  }
 0x113   :  { %2626 = vmatpush1.bf16.msra.mxu0 %v4868_v7  ;;  %2733 = vmatprep.subr.bf16.mxu1 %v4879_v14  ;;  %v4939_v7 = vld [vmem:[#allocation2 + $0x42c] ss:$24 sps:$4 sm:$0xff]  }
 0x114   :  { %2627 = vmatprep.subr.bf16.mxu0 %v4876_v12  ;;  %v4937_v12 = vld [vmem:[#allocation2 + $0x428] ss:$24 sps:$4 sm:$0xff]   ;;  %v4942_v14 = vld [vmem:[#allocation2 + $0xa54] ss:$24 sps:$4 sm:$0xff]  }
 0x116   :  { %2734 = vmatpush1.bf16.msra.mxu1 %v4877_v17  ;;  %v4940_v17 = vld [vmem:[#allocation2 + $0xa50] ss:$24 sps:$4 sm:$0xff]  }
 0x117   :  { %2628 = vmatpush1.bf16.msra.mxu0 %v4874_v15  ;;  %2735 = vmatprep.subr.bf16.mxu1 %v4885_v20  ;;  %v4945_v15 = vld [vmem:[#allocation2 + $0x45c] ss:$24 sps:$4 sm:$0xff]  }
 0x118   :  { %2629 = vmatprep.subr.bf16.mxu0 %v4882_v18  ;;  %v4943_v18 = vld [vmem:[#allocation2 + $0x458] ss:$24 sps:$4 sm:$0xff]   ;;  %v4948_v20 = vld [vmem:[#allocation2 + $0xa84] ss:$24 sps:$4 sm:$0xff]  }
 0x11a   :  { %2736 = vmatpush1.bf16.msra.mxu1 %v4883_v27  ;;  %v4946_v27 = vld [vmem:[#allocation2 + $0xa80] ss:$24 sps:$4 sm:$0xff]  }
 0x11b   :  { %2630 = vmatpush1.bf16.msra.mxu0 %v4880_v24  ;;  %2737 = vmatprep.subr.bf16.mxu1 %v4891_v30  ;;  %v4951_v24 = vld [vmem:[#allocation2 + $0x48c] ss:$24 sps:$4 sm:$0xff]  }
 0x11c   :  { %2631 = vmatprep.subr.bf16.mxu0 %v4888_v29  ;;  %v4949_v29 = vld [vmem:[#allocation2 + $0x488] ss:$24 sps:$4 sm:$0xff]   ;;  %v4954_v30 = vld [vmem:[#allocation2 + $0xab4] ss:$24 sps:$4 sm:$0xff]  }
 0x11e   :  { %2738 = vmatpush1.bf16.msra.mxu1 %v4889_v33  ;;  %v4952_v33 = vld [vmem:[#allocation2 + $0xab0] ss:$24 sps:$4 sm:$0xff]  }
 0x11f   :  { %2632 = vmatpush1.bf16.msra.mxu0 %v4886_v31  ;;  %2739 = vmatprep.subr.bf16.mxu1 %v4897_v37  ;;  %v4957_v31 = vld [vmem:[#allocation2 + $0x4bc] ss:$24 sps:$4 sm:$0xff]  }
 0x120   :  { %2633 = vmatprep.subr.bf16.mxu0 %v4894_v35  ;;  %v4955_v35 = vld [vmem:[#allocation2 + $0x4b8] ss:$24 sps:$4 sm:$0xff]   ;;  %v4960_v37 = vld [vmem:[#allocation2 + $0xae4] ss:$24 sps:$4 sm:$0xff]  }
 0x122   :  { %2740 = vmatpush1.bf16.msra.mxu1 %v4895_v41  ;;  %v4961_v41 = vld [vmem:[#allocation2 + $0x4e8] ss:$24 sps:$4 sm:$0xff]  }
 0x123   :  { %2634 = vmatpush1.bf16.msra.mxu0 %v4892_v40  ;;  %2762 = vmatprep.subr.bf16.mxu1 %v4903_v43  ;;  %v4958_v40 = vld [vmem:[#allocation2 + $0xae0] ss:$24 sps:$4 sm:$0xff]   ;;  %v4969_v43 = vld [vmem:[#allocation2 + $0x51c] ss:$24 sps:$4 sm:$0xff]  }
 0x124   :  { %2656 = vmatprep.subr.bf16.mxu0 %v4900_v42  ;;  %v4966_v42 = vld [vmem:[#allocation2 + $0xb14] ss:$24 sps:$4 sm:$0xff]  }
 0x125   :  { %4381 = vmatmul.mubr.msk.bf16.vlgmr.msra.gmra.mrb[8].mxu1 %vm5615_vm11, %v5464_v21 }
 0x126   :  { %4365 = vmatmul.mubr.msk.bf16.vlgmr.msra.gmra.mrb[0].mxu0 %vm5692_vm6, %v5464_v21  ;;  %4383 = vmatprep.mubr.msk.bf16.mxu1 %vm5634_vm0, %v5464_v21  ;;  %vm5725_vm0 = vmpackc.low %vm128_vm2, %vm120_vm5  ;;  %vm144_vm2 = vcmp.eq.s32.totalorder %v5710_v32, %v5588_v16  ;;  %v5003_v32 = vld [vmem:[#allocation2 + $0x40] ss:$24 sps:$4 sm:$0xff]  }
 0x127   :  { %4367 = vmatprep.mubr.msk.bf16.mxu0 %vm5696_vm10, %v5464_v21  ;;  %2657 = vmatpush1.bf16.msra.mxu0 %v4898_v45  ;;  %v5980_v58 = vsel %vm5725_vm0, 4294967295, %v5979_v58  ;;  %v4964_v45 = vld [vmem:[#allocation2 + $0xb10] ss:$24 sps:$4 sm:$0xff]  }
 0x128   :  { %2763 = vmatpush1.bf16.msra.mxu1 %v4901_v46  ;;  %2658 = vmatprep.subr.bf16.mxu0 %v4906_v48  ;;  %v4967_v46 = vld [vmem:[#allocation2 + $0x518] ss:$24 sps:$4 sm:$0xff]   ;;  %v4972_v48 = vld [vmem:[#allocation2 + $0xb44] ss:$24 sps:$4 sm:$0xff]  }
 0x129   :  { %2764 = vmatprep.subr.bf16.mxu1 %v4909_v49  ;;  %v4975_v49 = vld [vmem:[#allocation2 + $0x54c] ss:$24 sps:$4 sm:$0xff]  }
 0x12b   :  { %2659 = vmatpush1.bf16.msra.mxu0 %v4904_v50  ;;  %v99_v50 = vadd.s32 768, %v5577_v8  ;;  %v4993_v8 = vld [vmem:[#allocation2 + $0x5dc] ss:$24 sps:$4 sm:$0xff]  }
 0x12c   :  { %2765 = vmatpush1.bf16.msra.mxu1 %v4907_v51  ;;  %2660 = vmatprep.subr.bf16.mxu0 %v4912_v52  ;;  %v4970_v51 = vld [vmem:[#allocation2 + $0xb40] ss:$24 sps:$4 sm:$0xff]  }
 0x12d   :  { %4385 = vmatmul.mubr.msk.bf16.gmra.mrb[12].mxu1 %vm5657_vm8, %v5464_v21  ;;  %2766 = vmatprep.subr.bf16.mxu1 %v4915_v53  ;;  %v4973_v52 = vld [vmem:[#allocation2 + $0x548] ss:$24 sps:$4 sm:$0xff]   ;;  %v4978_v53 = vld [vmem:[#allocation2 + $0xb74] ss:$24 sps:$4 sm:$0xff]   ;;  %vm127_vm12 = vcmp.eq.s32.totalorder %v99_v50, %v5585_v13  ;;  %vm119_vm5 = vcmp.eq.s32.totalorder %v99_v50, %v5579_v9  ;;  %v5000_v9 = vld [vmem:[#allocation2 + $0x638] ss:$24 sps:$4 sm:$0xff]  }
 0x12e   :  { %4369 = vmatmul.mubr.msk.bf16.gmra.mrb[4].mxu0 %vm5719_vm3, %v5464_v21  ;;  %4387 = vmatprep.mubr.msk.bf16.mxu1 %vm5604_vm7, %v5464_v21  ;;  %vm5748_vm7 = vmpackc.low %vm127_vm12, %vm119_vm5  ;;  %v4997_v13 = vld [vmem:[#allocation2 + $0x10] ss:$24 sps:$4 sm:$0xff]   ;;  %vm135_vm12 = vcmp.eq.s32.totalorder %v99_v50, %v5581_v10  ;;  %v5014_v10 = vld [vmem:[#allocation2 + $0x69c] ss:$24 sps:$4 sm:$0xff]   ;;  %vm5989_vm5 = vnez %v5958_v22 }
 0x12f   :  { %2661 = vmatpush1.bf16.msra.mxu0 %v4910_v54  ;;  %4371 = vmatprep.mubr.msk.bf16.mxu0 %vm5725_vm0, %v5464_v21  ;;  %v4981_v54 = vld [vmem:[#allocation2 + $0x57c] ss:$24 sps:$4 sm:$0xff]   ;;  %vm5752_vm0 = vmpackc.low %vm144_vm2, %vm136_vm14  ;;  %vm143_vm14 = vcmp.eq.s32.totalorder %v99_v50, %v5588_v16  ;;  %v5120_v22 = vld [vmem:[#allocation2 + $0x9f8] ss:$24 sps:$4 sm:$0xff]  }
 0x130   :  { %2767 = vmatpush1.bf16.msra.mxu1 %v4913_v56  ;;  %2662 = vmatprep.subr.bf16.mxu0 %v4918_v57  ;;  %v4976_v56 = vld [vmem:[#allocation2 + $0xb70] ss:$24 sps:$4 sm:$0xff]   ;;  %vm5770_vm2 = vmpackc.low %vm143_vm14, %vm135_vm12  ;;  %v5017_v16 = vld [vmem:[#allocation2 + $0xa4] ss:$24 sps:$4 sm:$0xff]   ;;  %vm5469_vm12 = vmmov 0   ;;  %vm3827_vm14 = vcmask 130048  }
 0x131   :  { %2768 = vmatprep.subr.bf16.mxu1 %v4921_v59  ;;  %v4979_v57 = vld [vmem:[#allocation2 + $0x578] ss:$24 sps:$4 sm:$0xff]   ;;  %v4984_v59 = vld [vmem:[#allocation2 + $0xba4] ss:$24 sps:$4 sm:$0xff]   ;;  %v5047_v50 = vld [vmem:[#allocation2 + $0x194] ss:$24 sps:$4 sm:$0xff]  }
 0x133   :  { %2663 = vmatpush1.bf16.msra.mxu0 %v4916_v60  ;;  %v4987_v60 = vld [vmem:[#allocation2 + $0x5ac] ss:$24 sps:$4 sm:$0xff]  }
 0x134   :  { %2769 = vmatpush1.bf16.msra.mxu1 %v4919_v61  ;;  %2664 = vmatprep.subr.bf16.mxu0 %v4924_v62  ;;  %v4982_v61 = vld [vmem:[#allocation2 + $0xba0] ss:$24 sps:$4 sm:$0xff]  }
 0x135   :  { %2770 = vmatprep.subr.bf16.mxu1 %v4927_v63  ;;  %v4985_v62 = vld [vmem:[#allocation2 + $0x5a8] ss:$24 sps:$4 sm:$0xff]   ;;  %v4990_v63 = vld [vmem:[#allocation2 + $0xbd4] ss:$24 sps:$4 sm:$0xff]  }
 0x137   :  { %2665 = vmatpush1.bf16.msra.mxu0 %v4922_v0  ;;  %v4988_v0 = vld [vmem:[#allocation2 + $0xbd0] ss:$24 sps:$4 sm:$0xff]  }
 0x138   :  { %2771 = vmatpush1.bf16.msra.mxu1 %v4925_v1  ;;  %2666 = vmatprep.subr.bf16.mxu0 %v4930_v2  ;;  %v4991_v1 = vld [vmem:[#allocation2 + $0x5d8] ss:$24 sps:$4 sm:$0xff]   ;;  %v4996_v2 = vld [vmem:[#allocation2 + $0x60c] ss:$24 sps:$4 sm:$0xff]  }
 0x139   :  { %2772 = vmatprep.subr.bf16.mxu1 %v4933_v3  ;;  %v4999_v3 = vld [vmem:[#allocation2 + $0x14] ss:$24 sps:$4 sm:$0xff]  }
 0x13b   :  { %2667 = vmatpush1.bf16.msra.mxu0 %v4928_v4 }
 0x13c   :  { %2773 = vmatpush1.bf16.msra.mxu1 %v4931_v5  ;;  %2668 = vmatprep.subr.bf16.mxu0 %v4936_v6  ;;  %v4994_v5 = vld [vmem:[#allocation2 + $0x608] ss:$24 sps:$4 sm:$0xff]  }
 0x13d   :  { %2774 = vmatprep.subr.bf16.mxu1 %v4939_v7  ;;  %v5002_v7 = vld [vmem:[#allocation2 + $0x63c] ss:$24 sps:$4 sm:$0xff]   ;;  %v5317_v6 = vld [vmem:[#allocation4 + $0x108] sm:$0xff]  }
 0x13f   :  { %2669 = vmatpush1.bf16.msra.mxu0 %v4934_v11  ;;  %v5005_v11 = vld [vmem:[#allocation2 + $0x44] ss:$24 sps:$4 sm:$0xff]  }
 0x140   :  { %2775 = vmatpush1.bf16.msra.mxu1 %v4937_v12  ;;  %2670 = vmatprep.subr.bf16.mxu0 %v4942_v14  ;;  %v5008_v12 = vld [vmem:[#allocation2 + $0x66c] ss:$24 sps:$4 sm:$0xff]  }
 0x141   :  { %2776 = vmatprep.subr.bf16.mxu1 %v4945_v15  ;;  %v5006_v15 = vld [vmem:[#allocation2 + $0x668] ss:$24 sps:$4 sm:$0xff]  }
 0x143   :  { %2671 = vmatpush1.bf16.msra.mxu0 %v4940_v17  ;;  %v5011_v17 = vld [vmem:[#allocation2 + $0x74] ss:$24 sps:$4 sm:$0xff]  }
 0x144   :  { %2777 = vmatpush1.bf16.msra.mxu1 %v4943_v18  ;;  %2672 = vmatprep.subr.bf16.mxu0 %v4948_v20  ;;  %v5009_v18 = vld [vmem:[#allocation2 + $0x70] ss:$24 sps:$4 sm:$0xff]  }
 0x145   :  { %2778 = vmatprep.subr.bf16.mxu1 %v4951_v24  ;;  %v5012_v20 = vld [vmem:[#allocation2 + $0x698] ss:$24 sps:$4 sm:$0xff]  }
 0x146   :  { %v5015_v24 = vld [vmem:[#allocation2 + $0xa0] ss:$24 sps:$4 sm:$0xff]  }
 0x147   :  { %2673 = vmatpush1.bf16.msra.mxu0 %v4946_v27  ;;  %v5020_v27 = vld [vmem:[#allocation2 + $0x6cc] ss:$24 sps:$4 sm:$0xff]  }
 0x148   :  { %2779 = vmatpush1.bf16.msra.mxu1 %v4949_v29  ;;  %2674 = vmatprep.subr.bf16.mxu0 %v4954_v30  ;;  %v5018_v29 = vld [vmem:[#allocation2 + $0x6c8] ss:$24 sps:$4 sm:$0xff]   ;;  %v5023_v30 = vld [vmem:[#allocation2 + $0xd4] ss:$24 sps:$4 sm:$0xff]  }
 0x149   :  { %2780 = vmatprep.subr.bf16.mxu1 %v4957_v31  ;;  %v5021_v31 = vld [vmem:[#allocation2 + $0xd0] ss:$24 sps:$4 sm:$0xff]  }
 0x14b   :  { %2675 = vmatpush1.bf16.msra.mxu0 %v4952_v33  ;;  %v5026_v33 = vld [vmem:[#allocation2 + $0x6fc] ss:$24 sps:$4 sm:$0xff]  }
 0x14c   :  { %2781 = vmatpush1.bf16.msra.mxu1 %v4955_v35  ;;  %2676 = vmatprep.subr.bf16.mxu0 %v4960_v37  ;;  %v5024_v35 = vld [vmem:[#allocation2 + $0x6f8] ss:$24 sps:$4 sm:$0xff]  }
 0x14d   :  { %2782 = vmatprep.subr.bf16.mxu1 %v4963_v38  ;;  %v5027_v37 = vld [vmem:[#allocation2 + $0x100] ss:$24 sps:$4 sm:$0xff]   ;;  %v5032_v38 = vld [vmem:[#allocation2 + $0x72c] ss:$24 sps:$4 sm:$0xff]  }
 0x14f   :  { %2677 = vmatpush1.bf16.msra.mxu0 %v4958_v40  ;;  %v5035_v40 = vld [vmem:[#allocation2 + $0x134] ss:$24 sps:$4 sm:$0xff]  }
 0x150   :  { %2783 = vmatpush1.bf16.msra.mxu1 %v4961_v41  ;;  %2678 = vmatprep.subr.bf16.mxu0 %v4966_v42  ;;  %v5030_v41 = vld [vmem:[#allocation2 + $0x728] ss:$24 sps:$4 sm:$0xff]  }
 0x151   :  { %2784 = vmatprep.subr.bf16.mxu1 %v4969_v43  ;;  %v5033_v42 = vld [vmem:[#allocation2 + $0x130] ss:$24 sps:$4 sm:$0xff]   ;;  %v5038_v43 = vld [vmem:[#allocation2 + $0x75c] ss:$24 sps:$4 sm:$0xff]  }
 0x153   :  { %2679 = vmatpush1.bf16.msra.mxu0 %v4964_v45  ;;  %v5041_v45 = vld [vmem:[#allocation2 + $0x164] ss:$24 sps:$4 sm:$0xff]  }
 0x154   :  { %2785 = vmatpush1.bf16.msra.mxu1 %v4967_v46  ;;  %2680 = vmatprep.subr.bf16.mxu0 %v4972_v48  ;;  %v5036_v46 = vld [vmem:[#allocation2 + $0x758] ss:$24 sps:$4 sm:$0xff]  }
 0x155   :  { %2786 = vmatprep.subr.bf16.mxu1 %v4975_v49  ;;  %v5039_v48 = vld [vmem:[#allocation2 + $0x160] ss:$24 sps:$4 sm:$0xff]   ;;  %v5044_v49 = vld [vmem:[#allocation2 + $0x78c] ss:$24 sps:$4 sm:$0xff]  }
 0x157   :  { %2681 = vmatpush1.bf16.msra.mxu0 %v4970_v51  ;;  %v5042_v51 = vld [vmem:[#allocation2 + $0x788] ss:$24 sps:$4 sm:$0xff]  }
 0x158   :  { %2787 = vmatpush1.bf16.msra.mxu1 %v4973_v52  ;;  %2682 = vmatprep.subr.bf16.mxu0 %v4978_v53  ;;  %v5045_v52 = vld [vmem:[#allocation2 + $0x190] ss:$24 sps:$4 sm:$0xff]   ;;  %v5050_v53 = vld [vmem:[#allocation2 + $0x7bc] ss:$24 sps:$4 sm:$0xff]  }
 0x159   :  { %2788 = vmatprep.subr.bf16.mxu1 %v4981_v54  ;;  %v5053_v54 = vld [vmem:[#allocation2 + $0x1c4] ss:$24 sps:$4 sm:$0xff]  }
 0x15b   :  { %2683 = vmatpush1.bf16.msra.mxu0 %v4976_v56  ;;  %v5048_v56 = vld [vmem:[#allocation2 + $0x7b8] ss:$24 sps:$4 sm:$0xff]  }
 0x15c   :  { %2789 = vmatpush1.bf16.msra.mxu1 %v4979_v57  ;;  %2684 = vmatprep.subr.bf16.mxu0 %v4984_v59  ;;  %v5051_v57 = vld [vmem:[#allocation2 + $0x1c0] ss:$24 sps:$4 sm:$0xff]   ;;  %v5056_v59 = vld [vmem:[#allocation2 + $0x7ec] ss:$24 sps:$4 sm:$0xff]  }
 0x15d   :  { %2790 = vmatprep.subr.bf16.mxu1 %v4987_v60  ;;  %v5059_v60 = vld [vmem:[#allocation2 + $0x1f4] ss:$24 sps:$4 sm:$0xff]  }
 0x15f   :  { %2685 = vmatpush1.bf16.msra.mxu0 %v4982_v61  ;;  %v5054_v61 = vld [vmem:[#allocation2 + $0x7e8] ss:$24 sps:$4 sm:$0xff]  }
 0x160   :  { %2791 = vmatpush1.bf16.msra.mxu1 %v4985_v62  ;;  %2686 = vmatprep.subr.bf16.mxu0 %v4990_v63  ;;  %v5057_v62 = vld [vmem:[#allocation2 + $0x1f0] ss:$24 sps:$4 sm:$0xff]   ;;  %v5062_v63 = vld [vmem:[#allocation2 + $0x81c] ss:$24 sps:$4 sm:$0xff]  }
 0x161   :  { %2792 = vmatprep.subr.bf16.mxu1 %v4993_v8  ;;  %v5065_v8 = vld [vmem:[#allocation2 + $0x224] ss:$24 sps:$4 sm:$0xff]  }
 0x163   :  { %2687 = vmatpush1.bf16.msra.mxu0 %v4988_v0  ;;  %v5060_v0 = vld [vmem:[#allocation2 + $0x818] ss:$24 sps:$4 sm:$0xff]  }
 0x164   :  { %2793 = vmatpush1.bf16.msra.mxu1 %v4991_v1  ;;  %2921 = vmatprep.subr.bf16.mxu0 %v4999_v3  ;;  %v5063_v1 = vld [vmem:[#allocation2 + $0x220] ss:$24 sps:$4 sm:$0xff]   ;;  %v5071_v3 = vld [vmem:[#allocation2 + $0x254] ss:$24 sps:$4 sm:$0xff]  }
 0x165   :  { %2815 = vmatprep.subr.bf16.mxu1 %v4996_v2  ;;  %v5068_v2 = vld [vmem:[#allocation2 + $0x84c] ss:$24 sps:$4 sm:$0xff]  }
 0x166   :  { %4373 = vmatmul.mubr.msk.bf16.vlgmr.msra.gmra.mrb[0].mxu0 %vm5748_vm7, %v5464_v21 }
 0x167   :  { %4389 = vmatmul.mubr.msk.bf16.vlgmr.msra.gmra.mrb[8].mxu1 %vm5627_vm15, %v5464_v21  ;;  %4375 = vmatprep.mubr.msk.bf16.mxu0 %vm5752_vm0, %v5464_v21 }
 0x168   :  { %4391 = vmatprep.mubr.msk.bf16.mxu1 %vm5638_vm1, %v5464_v21  ;;  %2816 = vmatpush1.bf16.msra.mxu1 %v4994_v5  ;;  %v5066_v5 = vld [vmem:[#allocation2 + $0x848] ss:$24 sps:$4 sm:$0xff]  }
 0x169   :  { %2922 = vmatpush1.bf16.msra.mxu0 %v4997_v13  ;;  %2817 = vmatprep.subr.bf16.mxu1 %v5002_v7  ;;  %v5069_v13 = vld [vmem:[#allocation2 + $0x250] ss:$24 sps:$4 sm:$0xff]   ;;  %v5074_v7 = vld [vmem:[#allocation2 + $0x87c] ss:$24 sps:$4 sm:$0xff]  }
 0x16a   :  { %2923 = vmatprep.subr.bf16.mxu0 %v5005_v11  ;;  %v5077_v11 = vld [vmem:[#allocation2 + $0x284] ss:$24 sps:$4 sm:$0xff]  }
 0x16c   :  { %2818 = vmatpush1.bf16.msra.mxu1 %v5000_v9  ;;  %v5072_v9 = vld [vmem:[#allocation2 + $0x878] ss:$24 sps:$4 sm:$0xff]  }
 0x16d   :  { %2924 = vmatpush1.bf16.msra.mxu0 %v5003_v32  ;;  %2819 = vmatprep.subr.bf16.mxu1 %v5008_v12  ;;  %v5075_v32 = vld [vmem:[#allocation2 + $0x280] ss:$24 sps:$4 sm:$0xff]   ;;  %v5080_v12 = vld [vmem:[#allocation2 + $0x8ac] ss:$24 sps:$4 sm:$0xff]  }
 0x16e   :  { %4377 = vmatmul.mubr.msk.bf16.gmra.mrb[4].mxu0 %vm5770_vm2, %v5464_v21  ;;  %2925 = vmatprep.subr.bf16.mxu0 %v5011_v17  ;;  %v5078_v17 = vld [vmem:[#allocation2 + $0x8a8] ss:$24 sps:$4 sm:$0xff]  }
 0x16f   :  { %4393 = vmatmul.mubr.msk.bf16.gmra.mrb[12].mxu1 %vm5661_vm9, %v5464_v21  ;;  %4411 = vmatprep.mubr.msk.bf16.mxu0 %vm5595_vm4, %v5464_v21  ;;  %vm5987_vm4 = vnez %v5964_v26  ;;  %v5113_v26 = vld [vmem:[#allocation2 + $0x3a4] ss:$24 sps:$4 sm:$0xff]  }
 0x170   :  { %2820 = vmatpush1.bf16.msra.mxu1 %v5006_v15  ;;  %4395 = vmatprep.mubr.msk.bf16.mxu1 %vm5675_vm13, %v5464_v21  ;;  %v5083_v15 = vld [vmem:[#allocation2 + $0x2b4] ss:$24 sps:$4 sm:$0xff]  }
 0x171   :  { %2926 = vmatpush1.bf16.msra.mxu0 %v5009_v18  ;;  %2821 = vmatprep.subr.bf16.mxu1 %v5014_v10  ;;  %v5081_v18 = vld [vmem:[#allocation2 + $0x2b0] ss:$24 sps:$4 sm:$0xff]   ;;  %v5086_v10 = vld [vmem:[#allocation2 + $0x8dc] ss:$24 sps:$4 sm:$0xff]  }
 0x172   :  { %2927 = vmatprep.subr.bf16.mxu0 %v5017_v16  ;;  %v5089_v16 = vld [vmem:[#allocation2 + $0x2e4] ss:$24 sps:$4 sm:$0xff]  }
 0x174   :  { %2822 = vmatpush1.bf16.msra.mxu1 %v5012_v20  ;;  %v5084_v20 = vld [vmem:[#allocation2 + $0x8d8] ss:$24 sps:$4 sm:$0xff]  }
 0x175   :  { %2928 = vmatpush1.bf16.msra.mxu0 %v5015_v24  ;;  %2823 = vmatprep.subr.bf16.mxu1 %v5020_v27  ;;  %v5087_v24 = vld [vmem:[#allocation2 + $0x2e0] ss:$24 sps:$4 sm:$0xff]   ;;  %v5092_v27 = vld [vmem:[#allocation2 + $0x90c] ss:$24 sps:$4 sm:$0xff]  }
 0x176   :  { %2929 = vmatprep.subr.bf16.mxu0 %v5023_v30  ;;  %v5090_v30 = vld [vmem:[#allocation2 + $0x908] ss:$24 sps:$4 sm:$0xff]  }
 0x178   :  { %2824 = vmatpush1.bf16.msra.mxu1 %v5018_v29  ;;  %v5095_v29 = vld [vmem:[#allocation2 + $0x314] ss:$24 sps:$4 sm:$0xff]  }
 0x179   :  { %2930 = vmatpush1.bf16.msra.mxu0 %v5021_v31  ;;  %2825 = vmatprep.subr.bf16.mxu1 %v5026_v33  ;;  %v5093_v31 = vld [vmem:[#allocation2 + $0x310] ss:$24 sps:$4 sm:$0xff]   ;;  %v5098_v33 = vld [vmem:[#allocation2 + $0x93c] ss:$24 sps:$4 sm:$0xff]  }
 0x17a   :  { %2931 = vmatprep.subr.bf16.mxu0 %v5029_v19  ;;  %v5101_v19 = vld [vmem:[#allocation2 + $0x344] ss:$24 sps:$4 sm:$0xff]  }
 0x17c   :  { %2826 = vmatpush1.bf16.msra.mxu1 %v5024_v35  ;;  %v5096_v35 = vld [vmem:[#allocation2 + $0x938] ss:$24 sps:$4 sm:$0xff]  }
 0x17d   :  { %2932 = vmatpush1.bf16.msra.mxu0 %v5027_v37  ;;  %2827 = vmatprep.subr.bf16.mxu1 %v5032_v38  ;;  %v5099_v37 = vld [vmem:[#allocation2 + $0x340] ss:$24 sps:$4 sm:$0xff]   ;;  %v5104_v38 = vld [vmem:[#allocation2 + $0x96c] ss:$24 sps:$4 sm:$0xff]  }
 0x17e   :  { %2933 = vmatprep.subr.bf16.mxu0 %v5035_v40  ;;  %v5107_v40 = vld [vmem:[#allocation2 + $0x374] ss:$24 sps:$4 sm:$0xff]  }
 0x180   :  { %2828 = vmatpush1.bf16.msra.mxu1 %v5030_v41  ;;  %v5102_v41 = vld [vmem:[#allocation2 + $0x968] ss:$24 sps:$4 sm:$0xff]  }
 0x181   :  { %2934 = vmatpush1.bf16.msra.mxu0 %v5033_v42  ;;  %2829 = vmatprep.subr.bf16.mxu1 %v5038_v43  ;;  %v5110_v42 = vld [vmem:[#allocation2 + $0x99c] ss:$24 sps:$4 sm:$0xff]   ;;  %v5108_v43 = vld [vmem:[#allocation2 + $0x998] ss:$24 sps:$4 sm:$0xff]  }
 0x182   :  { %2935 = vmatprep.subr.bf16.mxu0 %v5041_v45  ;;  %v5111_v45 = vld [vmem:[#allocation2 + $0x3a0] ss:$24 sps:$4 sm:$0xff]  }
 0x184   :  { %2830 = vmatpush1.bf16.msra.mxu1 %v5036_v46  ;;  %v5116_v46 = vld [vmem:[#allocation2 + $0x9cc] ss:$24 sps:$4 sm:$0xff]  }
 0x185   :  { %2936 = vmatpush1.bf16.msra.mxu0 %v5039_v48  ;;  %2831 = vmatprep.subr.bf16.mxu1 %v5044_v49  ;;  %v5119_v48 = vld [vmem:[#allocation2 + $0x3d4] ss:$24 sps:$4 sm:$0xff]   ;;  %v5114_v49 = vld [vmem:[#allocation2 + $0x9c8] ss:$24 sps:$4 sm:$0xff]  }
 0x186   :  { %2937 = vmatprep.subr.bf16.mxu0 %v5047_v50  ;;  %v5122_v50 = vld [vmem:[#allocation2 + $0x9fc] ss:$24 sps:$4 sm:$0xff]  }
 0x188   :  { %2832 = vmatpush1.bf16.msra.mxu1 %v5042_v51  ;;  %v5125_v51 = vld [vmem:[#allocation2 + $0x404] ss:$24 sps:$4 sm:$0xff]  }
 0x189   :  { %2938 = vmatpush1.bf16.msra.mxu0 %v5045_v52  ;;  %2833 = vmatprep.subr.bf16.mxu1 %v5050_v53 }
 0x18a   :  { %2939 = vmatprep.subr.bf16.mxu0 %v5053_v54  ;;  %v5123_v54 = vld [vmem:[#allocation2 + $0x400] ss:$24 sps:$4 sm:$0xff]  }
 0x18c   :  { %2834 = vmatpush1.bf16.msra.mxu1 %v5048_v56 }
 0x18d   :  { %2940 = vmatpush1.bf16.msra.mxu0 %v5051_v57  ;;  %2835 = vmatprep.subr.bf16.mxu1 %v5056_v59  ;;  %v5128_v57 = vld [vmem:[#allocation2 + $0xa2c] ss:$24 sps:$4 sm:$0xff]  }
 0x18e   :  { %2941 = vmatprep.subr.bf16.mxu0 %v5059_v60  ;;  %v5131_v60 = vld [vmem:[#allocation2 + $0x434] ss:$24 sps:$4 sm:$0xff]  }
 0x190   :  { %2836 = vmatpush1.bf16.msra.mxu1 %v5054_v61  ;;  %v5126_v61 = vld [vmem:[#allocation2 + $0xa28] ss:$24 sps:$4 sm:$0xff]  }
 0x191   :  { %2942 = vmatpush1.bf16.msra.mxu0 %v5057_v62  ;;  %2837 = vmatprep.subr.bf16.mxu1 %v5062_v63  ;;  %v5129_v62 = vld [vmem:[#allocation2 + $0x430] ss:$24 sps:$4 sm:$0xff]   ;;  %v5134_v63 = vld [vmem:[#allocation2 + $0xa5c] ss:$24 sps:$4 sm:$0xff]  }
 0x192   :  { %2943 = vmatprep.subr.bf16.mxu0 %v5065_v8  ;;  %v5137_v8 = vld [vmem:[#allocation2 + $0x464] ss:$24 sps:$4 sm:$0xff]  }
 0x194   :  { %2838 = vmatpush1.bf16.msra.mxu1 %v5060_v0 }
 0x195   :  { %2944 = vmatpush1.bf16.msra.mxu0 %v5063_v1  ;;  %2839 = vmatprep.subr.bf16.mxu1 %v5068_v2  ;;  %v5132_v1 = vld [vmem:[#allocation2 + $0xa58] ss:$24 sps:$4 sm:$0xff]  }
 0x196   :  { %2945 = vmatprep.subr.bf16.mxu0 %v5071_v3  ;;  %v5135_v3 = vld [vmem:[#allocation2 + $0x460] ss:$24 sps:$4 sm:$0xff]  }
 0x198   :  { %2840 = vmatpush1.bf16.msra.mxu1 %v5066_v5  ;;  %v5140_v5 = vld [vmem:[#allocation2 + $0xa8c] ss:$24 sps:$4 sm:$0xff]  }
 0x199   :  { %2946 = vmatpush1.bf16.msra.mxu0 %v5069_v13  ;;  %2841 = vmatprep.subr.bf16.mxu1 %v5074_v7  ;;  %v5143_v7 = vld [vmem:[#allocation2 + $0x494] ss:$24 sps:$4 sm:$0xff]  }
 0x19a   :  { %2947 = vmatprep.subr.bf16.mxu0 %v5077_v11 }
 0x19c   :  { %2842 = vmatpush1.bf16.msra.mxu1 %v5072_v9  ;;  %v5138_v9 = vld [vmem:[#allocation2 + $0xa88] ss:$24 sps:$4 sm:$0xff]  }
 0x19d   :  { %2948 = vmatpush1.bf16.msra.mxu0 %v5075_v32  ;;  %2843 = vmatprep.subr.bf16.mxu1 %v5080_v12  ;;  %v5141_v32 = vld [vmem:[#allocation2 + $0x490] ss:$24 sps:$4 sm:$0xff]   ;;  %v5146_v12 = vld [vmem:[#allocation2 + $0xabc] ss:$24 sps:$4 sm:$0xff]  }
 0x19e   :  { %2949 = vmatprep.subr.bf16.mxu0 %v5083_v15  ;;  %v5149_v15 = vld [vmem:[#allocation2 + $0x4c4] ss:$24 sps:$4 sm:$0xff]  }
 0x1a0   :  { %2844 = vmatpush1.bf16.msra.mxu1 %v5078_v17  ;;  %v5144_v17 = vld [vmem:[#allocation2 + $0xab8] ss:$24 sps:$4 sm:$0xff]  }
 0x1a1   :  { %2950 = vmatpush1.bf16.msra.mxu0 %v5081_v18  ;;  %2845 = vmatprep.subr.bf16.mxu1 %v5086_v10  ;;  %v5147_v18 = vld [vmem:[#allocation2 + $0x4c0] ss:$24 sps:$4 sm:$0xff]   ;;  %v5152_v10 = vld [vmem:[#allocation2 + $0xaec] ss:$24 sps:$4 sm:$0xff]  }
 0x1a2   :  { %2951 = vmatprep.subr.bf16.mxu0 %v5089_v16  ;;  %v5155_v16 = vld [vmem:[#allocation2 + $0x4f4] ss:$24 sps:$4 sm:$0xff]  }
 0x1a4   :  { %2846 = vmatpush1.bf16.msra.mxu1 %v5084_v20  ;;  %v5150_v20 = vld [vmem:[#allocation2 + $0xae8] ss:$24 sps:$4 sm:$0xff]  }
 0x1a5   :  { %2952 = vmatpush1.bf16.msra.mxu0 %v5087_v24  ;;  %2868 = vmatprep.subr.bf16.mxu1 %v5092_v27  ;;  %v5153_v24 = vld [vmem:[#allocation2 + $0x4f0] ss:$24 sps:$4 sm:$0xff]   ;;  %v5158_v27 = vld [vmem:[#allocation2 + $0xb1c] ss:$24 sps:$4 sm:$0xff]  }
 0x1a6   :  { %2974 = vmatprep.subr.bf16.mxu0 %v5095_v29  ;;  %v5161_v29 = vld [vmem:[#allocation2 + $0x524] ss:$24 sps:$4 sm:$0xff]  }
 0x1a7   :  { %4397 = vmatmul.mubr.msk.bf16.vlgmr.msra.gmra.mrb[8].mxu1 %vm5692_vm6, %v5464_v21 }
 0x1a8   :  { %4413 = vmatmul.mubr.msk.bf16.vlgmr.msra.gmra.mrb[8].mxu0 %vm5615_vm11, %v5464_v21  ;;  %4399 = vmatprep.mubr.msk.bf16.mxu1 %vm5696_vm10, %v5464_v21  ;;  %vm5988_vm11 = vnez %v5980_v58 }
 0x1a9   :  { %2869 = vmatpush1.bf16.msra.mxu1 %v5090_v30  ;;  %4415 = vmatprep.mubr.msk.bf16.mxu0 %vm5987_vm4, %v5464_v21  ;;  %v5156_v30 = vld [vmem:[#allocation2 + $0xb18] ss:$24 sps:$4 sm:$0xff]   ;;  %vm3840_vm4 = vcmask 1041408  }
 0x1aa   :  { %2975 = vmatpush1.bf16.msra.mxu0 %v5093_v31  ;;  %2870 = vmatprep.subr.bf16.mxu1 %v5098_v33  ;;  %v5159_v31 = vld [vmem:[#allocation2 + $0x520] ss:$24 sps:$4 sm:$0xff]   ;;  %v5164_v33 = vld [vmem:[#allocation2 + $0xb4c] ss:$24 sps:$4 sm:$0xff]  }
 0x1ab   :  { %2976 = vmatprep.subr.bf16.mxu0 %v5101_v19  ;;  %v5167_v19 = vld [vmem:[#allocation2 + $0x554] ss:$24 sps:$4 sm:$0xff]  }
 0x1ad   :  { %2871 = vmatpush1.bf16.msra.mxu1 %v5096_v35  ;;  %v5162_v35 = vld [vmem:[#allocation2 + $0xb48] ss:$24 sps:$4 sm:$0xff]  }
 0x1ae   :  { %2977 = vmatpush1.bf16.msra.mxu0 %v5099_v37  ;;  %2872 = vmatprep.subr.bf16.mxu1 %v5104_v38  ;;  %v5165_v37 = vld [vmem:[#allocation2 + $0x550] ss:$24 sps:$4 sm:$0xff]   ;;  %v5170_v38 = vld [vmem:[#allocation2 + $0xb7c] ss:$24 sps:$4 sm:$0xff]  }
 0x1af   :  { %4401 = vmatmul.mubr.msk.bf16.gmra.mrb[12].mxu1 %vm5719_vm3, %v5464_v21  ;;  %2978 = vmatprep.subr.bf16.mxu0 %v5107_v40  ;;  %v5173_v40 = vld [vmem:[#allocation2 + $0x584] ss:$24 sps:$4 sm:$0xff]  }
 0x1b0   :  { %4417 = vmatmul.mubr.msk.bf16.gmra.mrb[12].mxu0 %vm5657_vm8, %v5464_v21  ;;  %4403 = vmatprep.mubr.msk.bf16.mxu1 %vm5988_vm11, %v5464_v21  ;;  %vm3703_vm8 = vcmask 64512  }
 0x1b1   :  { %2873 = vmatpush1.bf16.msra.mxu1 %v5102_v41  ;;  %4419 = vmatprep.mubr.msk.bf16.mxu0 %vm5989_vm5, %v5464_v21  ;;  %v5168_v41 = vld [vmem:[#allocation2 + $0xb78] ss:$24 sps:$4 sm:$0xff]  }
 0x1b2   :  { %2979 = vmatpush1.bf16.msra.mxu0 %v5105_v23  ;;  %2874 = vmatprep.subr.bf16.mxu1 %v5110_v42  ;;  %v5171_v23 = vld [vmem:[#allocation2 + $0x580] ss:$24 sps:$4 sm:$0xff]   ;;  %v5176_v42 = vld [vmem:[#allocation2 + $0xbac] ss:$24 sps:$4 sm:$0xff]  }
 0x1b3   :  { %2980 = vmatprep.subr.bf16.mxu0 %v5113_v26  ;;  %v5179_v26 = vld [vmem:[#allocation2 + $0x5b4] ss:$24 sps:$4 sm:$0xff]  }
 0x1b5   :  { %2875 = vmatpush1.bf16.msra.mxu1 %v5108_v43  ;;  %v5174_v43 = vld [vmem:[#allocation2 + $0xba8] ss:$24 sps:$4 sm:$0xff]  }
 0x1b6   :  { %2981 = vmatpush1.bf16.msra.mxu0 %v5111_v45  ;;  %2876 = vmatprep.subr.bf16.mxu1 %v5116_v46  ;;  %v5177_v45 = vld [vmem:[#allocation2 + $0x5b0] ss:$24 sps:$4 sm:$0xff]   ;;  %v5182_v46 = vld [vmem:[#allocation2 + $0xbdc] ss:$24 sps:$4 sm:$0xff]  }
 0x1b7   :  { %2982 = vmatprep.subr.bf16.mxu0 %v5119_v48  ;;  %v5185_v48 = vld [vmem:[#allocation2 + $0x5e4] ss:$24 sps:$4 sm:$0xff]  }
 0x1b8   :  { %v5810_v52 = vpop.f32.mrb[0].mxu1 }
 0x1b9   :  { %2877 = vmatpush1.bf16.msra.mxu1 %v5114_v49  ;;  %v5812_v53 = vpop.f32.mrb[1].mxu1  ;;  %v5180_v49 = vld [vmem:[#allocation2 + $0xbd8] ss:$24 sps:$4 sm:$0xff]  }
 0x1ba   :  { %2983 = vmatpush1.bf16.msra.mxu0 %v5117_v34  ;;  %2878 = vmatprep.subr.bf16.mxu1 %v5122_v50  ;;  %v5814_v56 = vpop.f32.mrb[2].mxu1  ;;  %v5183_v34 = vld [vmem:[#allocation2 + $0x5e0] ss:$24 sps:$4 sm:$0xff]  }
 0x1bb   :  { %2984 = vmatprep.subr.bf16.mxu0 %v5125_v51  ;;  %v5816_v59 = vpop.f32.mrb[3].mxu1  ;;  %v5234_v50 = vld [vmem:[#allocation4 + $0x40] sm:$0xff]   ;;  %v5188_v51 = vld [vmem:[#allocation2 + $0x614] ss:$24 sps:$4 sm:$0xff]  }
 0x1bd   :  { %2879 = vmatpush1.bf16.msra.mxu1 %v5120_v22  ;;  %v5186_v22 = vld [vmem:[#allocation2 + $0x610] ss:$24 sps:$4 sm:$0xff]  }
 0x1be   :  { %2985 = vmatpush1.bf16.msra.mxu0 %v5123_v54  ;;  %2880 = vmatprep.subr.bf16.mxu1 %v5128_v57  ;;  %v5191_v54 = vld [vmem:[#allocation2 + $0x644] ss:$24 sps:$4 sm:$0xff]  }
 0x1bf   :  { %2986 = vmatprep.subr.bf16.mxu0 %v5131_v60  ;;  %v5235_v57 = vld [vmem:[#allocation4] sm:$0xff]   ;;  %v5239_v60 = vld [vmem:[#allocation4 + $0x48] sm:$0xff]  }
 0x1c0   :  { %v5818_v0 = vpop.f32.mrb[4].mxu1 }
 0x1c1   :  { %2881 = vmatpush1.bf16.msra.mxu1 %v5126_v61  ;;  %v5820_v2 = vpop.f32.mrb[5].mxu1  ;;  %v5189_v61 = vld [vmem:[#allocation2 + $0x640] ss:$24 sps:$4 sm:$0xff]  }
 0x1c2   :  { %2987 = vmatpush1.bf16.msra.mxu0 %v5129_v62  ;;  %2882 = vmatprep.subr.bf16.mxu1 %v5134_v63  ;;  %v5822_v13 = vpop.f32.mrb[6].mxu1  ;;  %v5194_v62 = vld [vmem:[#allocation2 + $0x674] ss:$24 sps:$4 sm:$0xff]  }
 0x1c3   :  { %2988 = vmatprep.subr.bf16.mxu0 %v5137_v8  ;;  %v5824_v11 = vpop.f32.mrb[7].mxu1  ;;  %v5240_v63 = vld [vmem:[#allocation4 + $0x8] sm:$0xff]   ;;  %v5244_v8 = vld [vmem:[#allocation4 + $0x50] sm:$0xff]  }
 0x1c5   :  { %2883 = vmatpush1.bf16.msra.mxu1 %v5132_v1  ;;  %v5192_v1 = vld [vmem:[#allocation2 + $0x670] ss:$24 sps:$4 sm:$0xff]  }
 0x1c6   :  { %2989 = vmatpush1.bf16.msra.mxu0 %v5135_v3  ;;  %2884 = vmatprep.subr.bf16.mxu1 %v5140_v5  ;;  %v5245_v3 = vld [vmem:[#allocation4 + $0x10] sm:$0xff]   ;;  %v5195_v5 = vld [vmem:[#allocation2 + $0x6a0] ss:$24 sps:$4 sm:$0xff]  }
 0x1c7   :  { %2990 = vmatprep.subr.bf16.mxu0 %v5143_v7  ;;  %v5200_v7 = vld [vmem:[#allocation2 + $0x6d4] ss:$24 sps:$4 sm:$0xff]  }
 0x1c9   :  { %2885 = vmatpush1.bf16.msra.mxu1 %v5138_v9  ;;  %v5250_v9 = vld [vmem:[#allocation4 + $0x18] sm:$0xff]  }
 0x1ca   :  { %2991 = vmatpush1.bf16.msra.mxu0 %v5141_v32  ;;  %2886 = vmatprep.subr.bf16.mxu1 %v5146_v12  ;;  %v5254_v32 = vld [vmem:[#allocation4 + $0x60] sm:$0xff]   ;;  %v5198_v12 = vld [vmem:[#allocation2 + $0x6d0] ss:$24 sps:$4 sm:$0xff]  }
 0x1cb   :  { %2992 = vmatprep.subr.bf16.mxu0 %v5149_v15  ;;  %v5203_v15 = vld [vmem:[#allocation2 + $0x704] ss:$24 sps:$4 sm:$0xff]  }
 0x1cd   :  { %2887 = vmatpush1.bf16.msra.mxu1 %v5144_v17  ;;  %v5255_v17 = vld [vmem:[#allocation4 + $0x20] sm:$0xff]  }
 0x1ce   :  { %2993 = vmatpush1.bf16.msra.mxu0 %v5147_v18  ;;  %2888 = vmatprep.subr.bf16.mxu1 %v5152_v10  ;;  %v5201_v18 = vld [vmem:[#allocation2 + $0x700] ss:$24 sps:$4 sm:$0xff]   ;;  %v5260_v10 = vld [vmem:[#allocation4 + $0x28] sm:$0xff]  }
 0x1cf   :  { %2994 = vmatprep.subr.bf16.mxu0 %v5155_v16  ;;  %v5264_v16 = vld [vmem:[#allocation4 + $0x70] sm:$0xff]  }
 0x1d1   :  { %2889 = vmatpush1.bf16.msra.mxu1 %v5150_v20  ;;  %v5204_v20 = vld [vmem:[#allocation2 + $0x730] ss:$24 sps:$4 sm:$0xff]  }
 0x1d2   :  { %2995 = vmatpush1.bf16.msra.mxu0 %v5153_v24  ;;  %2890 = vmatprep.subr.bf16.mxu1 %v5158_v27  ;;  %v5209_v24 = vld [vmem:[#allocation2 + $0x764] ss:$24 sps:$4 sm:$0xff]   ;;  %v5265_v27 = vld [vmem:[#allocation4 + $0x30] sm:$0xff]  }
 0x1d3   :  { %2996 = vmatprep.subr.bf16.mxu0 %v5161_v29  ;;  %v5269_v29 = vld [vmem:[#allocation4 + $0x78] sm:$0xff]  }
 0x1d5   :  { %2891 = vmatpush1.bf16.msra.mxu1 %v5156_v30  ;;  %v5207_v30 = vld [vmem:[#allocation2 + $0x760] ss:$24 sps:$4 sm:$0xff]  }
 0x1d6   :  { %2997 = vmatpush1.bf16.msra.mxu0 %v5159_v31  ;;  %2892 = vmatprep.subr.bf16.mxu1 %v5164_v33  ;;  %v5212_v31 = vld [vmem:[#allocation2 + $0x794] ss:$24 sps:$4 sm:$0xff]   ;;  %v5270_v33 = vld [vmem:[#allocation4 + $0x38] sm:$0xff]  }
 0x1d7   :  { %2998 = vmatprep.subr.bf16.mxu0 %v5167_v19  ;;  %v5298_v19 = vld [vmem:[#allocation4 + $0xc0] sm:$0xff]  }
 0x1d9   :  { %2893 = vmatpush1.bf16.msra.mxu1 %v5162_v35  ;;  %v5210_v35 = vld [vmem:[#allocation2 + $0x790] ss:$24 sps:$4 sm:$0xff]  }
 0x1da   :  { %2999 = vmatpush1.bf16.msra.mxu0 %v5165_v37  ;;  %2894 = vmatprep.subr.bf16.mxu1 %v5170_v38  ;;  %v5215_v37 = vld [vmem:[#allocation2 + $0x7c4] ss:$24 sps:$4 sm:$0xff]   ;;  %v5213_v38 = vld [vmem:[#allocation2 + $0x7c0] ss:$24 sps:$4 sm:$0xff]  }
 0x1db   :  { %3000 = vmatprep.subr.bf16.mxu0 %v5173_v40  ;;  %v5218_v40 = vld [vmem:[#allocation2 + $0x7f4] ss:$24 sps:$4 sm:$0xff]  }
 0x1dd   :  { %2895 = vmatpush1.bf16.msra.mxu1 %v5168_v41  ;;  %v5216_v41 = vld [vmem:[#allocation2 + $0x7f0] ss:$24 sps:$4 sm:$0xff]  }
 0x1de   :  { %3001 = vmatpush1.bf16.msra.mxu0 %v5171_v23  ;;  %2896 = vmatprep.subr.bf16.mxu1 %v5176_v42  ;;  %v5221_v23 = vld [vmem:[#allocation2 + $0x824] ss:$24 sps:$4 sm:$0xff]   ;;  %v5219_v42 = vld [vmem:[#allocation2 + $0x820] ss:$24 sps:$4 sm:$0xff]  }
 0x1df   :  { %3002 = vmatprep.subr.bf16.mxu0 %v5179_v26  ;;  %v5224_v26 = vld [vmem:[#allocation2 + $0x854] ss:$24 sps:$4 sm:$0xff]  }
 0x1e1   :  { %2897 = vmatpush1.bf16.msra.mxu1 %v5174_v43  ;;  %v5222_v43 = vld [vmem:[#allocation2 + $0x850] ss:$24 sps:$4 sm:$0xff]  }
 0x1e2   :  { %3003 = vmatpush1.bf16.msra.mxu0 %v5177_v45  ;;  %2898 = vmatprep.subr.bf16.mxu1 %v5182_v46  ;;  %v5227_v45 = vld [vmem:[#allocation2 + $0x884] ss:$24 sps:$4 sm:$0xff]   ;;  %v5225_v46 = vld [vmem:[#allocation2 + $0x880] ss:$24 sps:$4 sm:$0xff]  }
 0x1e3   :  { %3004 = vmatprep.subr.bf16.mxu0 %v5185_v48  ;;  %v5230_v48 = vld [vmem:[#allocation2 + $0x8b4] ss:$24 sps:$4 sm:$0xff]  }
 0x1e5   :  { %2899 = vmatpush1.bf16.msra.mxu1 %v5180_v49  ;;  %v5228_v49 = vld [vmem:[#allocation2 + $0x8b0] ss:$24 sps:$4 sm:$0xff]  }
 0x1e6   :  { %3005 = vmatpush1.bf16.msra.mxu0 %v5183_v34  ;;  %4503 = vmatprep.subr.bf16.mxu1 %v5234_v50  ;;  %v5233_v34 = vld [vmem:[#allocation2 + $0x8e4] ss:$24 sps:$4 sm:$0xff]   ;;  %v5231_v50 = vld [vmem:[#allocation2 + $0x8e0] ss:$24 sps:$4 sm:$0xff]  }
 0x1e7   :  { %3027 = vmatprep.subr.bf16.mxu0 %v5188_v51  ;;  %v5238_v51 = vld [vmem:[#allocation2 + $0x914] ss:$24 sps:$4 sm:$0xff]  }
 0x1e8   :  { %4405 = vmatmul.mubr.msk.bf16.vlgmr.msra.gmra.mrb[8].mxu1 %vm5748_vm7, %v5464_v21 }
 0x1e9   :  { %4421 = vmatmul.mubr.msk.bf16.vlgmr.msra.gmra.mrb[8].mxu0 %vm5627_vm15, %v5464_v21  ;;  %4407 = vmatprep.mubr.msk.bf16.mxu1 %vm5752_vm0, %v5464_v21  ;;  %vm3723_vm15 = vcmask 1045504  }
 0x1ea   :  { %4423 = vmatprep.mubr.msk.bf16.mxu0 %vm5638_vm1, %v5464_v21  ;;  %3028 = vmatpush1.bf16.msra.mxu0 %v5186_v22  ;;  %v5236_v22 = vld [vmem:[#allocation2 + $0x910] ss:$24 sps:$4 sm:$0xff]   ;;  %vm3705_vm1 = vcmask 63488  }
 0x1eb   :  { %3029 = vmatprep.subr.bf16.mxu0 %v5191_v54  ;;  %4504 = vmatpush3.bf16.msra.mxu1 %v5235_v57  ;;  %v5243_v54 = vld [vmem:[#allocation2 + $0x944] ss:$24 sps:$4 sm:$0xff]   ;;  %v5241_v57 = vld [vmem:[#allocation2 + $0x940] ss:$24 sps:$4 sm:$0xff]  }
 0x1ec   :  { %4505 = vmatprep.subr.bf16.mxu1 %v5239_v60  ;;  %v5248_v60 = vld [vmem:[#allocation2 + $0x974] ss:$24 sps:$4 sm:$0xff]  }
 0x1ee   :  { %3030 = vmatpush1.bf16.msra.mxu0 %v5189_v61  ;;  %v5246_v61 = vld [vmem:[#allocation2 + $0x970] ss:$24 sps:$4 sm:$0xff]  }
 0x1ef   :  { %3031 = vmatprep.subr.bf16.mxu0 %v5194_v62  ;;  %4506 = vmatpush3.bf16.msra.mxu1 %v5240_v63  ;;  %v5253_v62 = vld [vmem:[#allocation2 + $0x9a4] ss:$24 sps:$4 sm:$0xff]   ;;  %v5256_v63 = vld [vmem:[#allocation2 + $0x9d0] ss:$24 sps:$4 sm:$0xff]  }
 0x1f0   :  { %4409 = vmatmul.mubr.msk.bf16.gmra.mrb[12].mxu1 %vm5770_vm2, %v5464_v21  ;;  %4507 = vmatprep.subr.bf16.mxu1 %v5244_v8  ;;  %v5263_v8 = vld [vmem:[#allocation2 + $0xa04] ss:$24 sps:$4 sm:$0xff]  }
 0x1f1   :  { %4425 = vmatmul.mubr.msk.bf16.gmra.mrb[12].mxu0 %vm5661_vm9, %v5464_v21  ;;  %vm3748_vm9 = vcmask 193664  }
 0x1f2   :  { %3032 = vmatpush1.bf16.msra.mxu0 %v5192_v1  ;;  %4427 = vmatprep.mubr.msk.bf16.mxu0 %vm5675_vm13, %v5464_v21  ;;  %vm3746_vm13 = vcmask 195712  }
 0x1f3   :  { %3033 = vmatprep.subr.bf16.mxu0 %v5197_v25  ;;  %4508 = vmatpush3.bf16.msra.mxu1 %v5245_v3 }
 0x1f4   :  { %4509 = vmatprep.subr.bf16.mxu1 %v5249_v28  ;;  %v5261_v28 = vld [vmem:[#allocation2 + $0xa00] ss:$24 sps:$4 sm:$0xff]  }
 0x1f6   :  { %3034 = vmatpush1.bf16.msra.mxu0 %v5195_v5 }
 0x1f7   :  { %3035 = vmatprep.subr.bf16.mxu0 %v5200_v7  ;;  %4510 = vmatpush3.bf16.msra.mxu1 %v5250_v9  ;;  %v5268_v7 = vld [vmem:[#allocation2 + $0xa34] ss:$24 sps:$4 sm:$0xff]  }
 0x1f8   :  { %4511 = vmatprep.subr.bf16.mxu1 %v5254_v32 }
 0x1fa   :  { %3036 = vmatpush1.bf16.msra.mxu0 %v5198_v12 }
 0x1fb   :  { %3037 = vmatprep.subr.bf16.mxu0 %v5203_v15  ;;  %4512 = vmatpush3.bf16.msra.mxu1 %v5255_v17  ;;  %v5266_v15 = vld [vmem:[#allocation2 + $0xa30] ss:$24 sps:$4 sm:$0xff]  }
 0x1fc   :  { %4513 = vmatprep.subr.bf16.mxu1 %v5259_v36  ;;  %v5273_v36 = vld [vmem:[#allocation2 + $0xa64] ss:$24 sps:$4 sm:$0xff]  }
 0x1fe   :  { %3038 = vmatpush1.bf16.msra.mxu0 %v5201_v18  ;;  %v5299_v18 = vld [vmem:[#allocation4 + $0x80] sm:$0xff]  }
 0x1ff   :  { %3039 = vmatprep.subr.bf16.mxu0 %v5206_v39  ;;  %4514 = vmatpush3.bf16.msra.mxu1 %v5260_v10 }
 0x200   :  { %4515 = vmatprep.subr.bf16.mxu1 %v5264_v16  ;;  %v5271_v16 = vld [vmem:[#allocation2 + $0xa60] ss:$24 sps:$4 sm:$0xff]  }
 0x202   :  { %3040 = vmatpush1.bf16.msra.mxu0 %v5204_v20  ;;  %v5276_v20 = vld [vmem:[#allocation2 + $0xa94] ss:$24 sps:$4 sm:$0xff]  }
 0x203   :  { %3041 = vmatprep.subr.bf16.mxu0 %v5209_v24  ;;  %4516 = vmatpush3.bf16.msra.mxu1 %v5265_v27  ;;  %v5301_v24 = vld [vmem:[#allocation4 + $0x88] sm:$0xff]  }
 0x204   :  { %4517 = vmatprep.subr.bf16.mxu1 %v5269_v29 }
 0x206   :  { %3042 = vmatpush1.bf16.msra.mxu0 %v5207_v30  ;;  %v5302_v30 = vld [vmem:[#allocation4 + $0xd0] sm:$0xff]  }
 0x207   :  { %3043 = vmatprep.subr.bf16.mxu0 %v5212_v31  ;;  %4518 = vmatpush3.bf16.msra.mxu1 %v5270_v33 }
 0x208   :  { %4531 = vmatprep.subr.bf16.mxu1 %v5298_v19 }
 0x20a   :  { %3044 = vmatpush1.bf16.msra.mxu0 %v5210_v35  ;;  %v5279_v35 = vld [vmem:[#allocation2 + $0xac4] ss:$24 sps:$4 sm:$0xff]  }
 0x20b   :  { %3045 = vmatprep.subr.bf16.mxu0 %v5215_v37  ;;  %v5304_v37 = vld [vmem:[#allocation4 + $0xd8] sm:$0xff]  }
 0x20e   :  { %3046 = vmatpush1.bf16.msra.mxu0 %v5213_v38  ;;  %v5277_v38 = vld [vmem:[#allocation2 + $0xac0] ss:$24 sps:$4 sm:$0xff]  }
 0x20f   :  { %3047 = vmatprep.subr.bf16.mxu0 %v5218_v40  ;;  %v5305_v40 = vld [vmem:[#allocation4 + $0x98] sm:$0xff]  }
 0x212   :  { %3048 = vmatpush1.bf16.msra.mxu0 %v5216_v41  ;;  %v5280_v41 = vld [vmem:[#allocation2 + $0xaf0] ss:$24 sps:$4 sm:$0xff]  }
 0x213   :  { %3049 = vmatprep.subr.bf16.mxu0 %v5221_v23  ;;  %v5285_v23 = vld [vmem:[#allocation2 + $0xb24] ss:$24 sps:$4 sm:$0xff]  }
 0x216   :  { %3050 = vmatpush1.bf16.msra.mxu0 %v5219_v42  ;;  %v5307_v42 = vld [vmem:[#allocation4 + $0xa0] sm:$0xff]  }
 0x217   :  { %3051 = vmatprep.subr.bf16.mxu0 %v5224_v26  ;;  %v5308_v26 = vld [vmem:[#allocation4 + $0xe8] sm:$0xff]  }
 0x21a   :  { %3052 = vmatpush1.bf16.msra.mxu0 %v5222_v43  ;;  %v5283_v43 = vld [vmem:[#allocation2 + $0xb20] ss:$24 sps:$4 sm:$0xff]  }
 0x21b   :  { %3053 = vmatprep.subr.bf16.mxu0 %v5227_v45  ;;  %v5288_v45 = vld [vmem:[#allocation2 + $0xb54] ss:$24 sps:$4 sm:$0xff]  }
 0x21e   :  { %3054 = vmatpush1.bf16.msra.mxu0 %v5225_v46  ;;  %v5309_v46 = vld [vmem:[#allocation4 + $0xa8] sm:$0xff]  }
 0x21f   :  { %3055 = vmatprep.subr.bf16.mxu0 %v5230_v48  ;;  %v5310_v48 = vld [vmem:[#allocation4 + $0xf0] sm:$0xff]  }
 0x222   :  { %3056 = vmatpush1.bf16.msra.mxu0 %v5228_v49  ;;  %v5286_v49 = vld [vmem:[#allocation2 + $0xb50] ss:$24 sps:$4 sm:$0xff]  }
 0x223   :  { %3057 = vmatprep.subr.bf16.mxu0 %v5233_v34  ;;  %v5291_v34 = vld [vmem:[#allocation2 + $0xb84] ss:$24 sps:$4 sm:$0xff]  }
 0x226   :  { %3058 = vmatpush1.bf16.msra.mxu0 %v5231_v50  ;;  %v5311_v50 = vld [vmem:[#allocation4 + $0xb0] sm:$0xff]  }
 0x227   :  { %3080 = vmatprep.subr.bf16.mxu0 %v5238_v51  ;;  %v5312_v51 = vld [vmem:[#allocation4 + $0xf8] sm:$0xff]  }
 0x229   :  { %4429 = vmatmul.mubr.msk.bf16.vlgmr.msra.gmra.mrb[8].mxu0 %vm5692_vm6, %v5464_v21  ;;  %vm3791_vm6 = vcmask 389440  }
 0x22a   :  { %4431 = vmatprep.mubr.msk.bf16.mxu0 %vm5696_vm10, %v5464_v21  ;;  %3081 = vmatpush1.bf16.msra.mxu0 %v5236_v22  ;;  %v5289_v22 = vld [vmem:[#allocation2 + $0xb80] ss:$24 sps:$4 sm:$0xff]   ;;  %vm3789_vm10 = vcmask 392512  }
 0x22b   :  { %3082 = vmatprep.subr.bf16.mxu0 %v5243_v54  ;;  %v5294_v54 = vld [vmem:[#allocation2 + $0xbb4] ss:$24 sps:$4 sm:$0xff]  }
 0x22e   :  { %3083 = vmatpush1.bf16.msra.mxu0 %v5241_v57  ;;  %v5313_v57 = vld [vmem:[#allocation4 + $0xb8] sm:$0xff]  }
 0x22f   :  { %3084 = vmatprep.subr.bf16.mxu0 %v5248_v60  ;;  %v5292_v60 = vld [vmem:[#allocation2 + $0xbb0] ss:$24 sps:$4 sm:$0xff]  }
 0x231   :  { %4433 = vmatmul.mubr.msk.bf16.gmra.mrb[12].mxu0 %vm5719_vm3, %v5464_v21  ;;  %vm3811_vm3 = vcmask 1041409  }
 0x232   :  { %3085 = vmatpush1.bf16.msra.mxu0 %v5246_v61  ;;  %4435 = vmatprep.mubr.msk.bf16.mxu0 %vm5988_vm11, %v5464_v21  ;;  %v5297_v61 = vld [vmem:[#allocation2 + $0xbe4] ss:$24 sps:$4 sm:$0xff]   ;;  %vm4500_vm11 = vmpackc.low %vm3840_vm4, %vm3840_vm4 }
 0x233   :  { %3086 = vmatprep.subr.bf16.mxu0 %v5253_v62  ;;  %v5295_v62 = vld [vmem:[#allocation2 + $0xbe0] ss:$24 sps:$4 sm:$0xff]  }
 0x236   :  { %3087 = vmatpush1.bf16.msra.mxu0 %v5251_v44  ;;  %v5314_v44 = vld [vmem:[#allocation4 + $0x140] sm:$0xff]  }
 0x237   :  { %3088 = vmatprep.subr.bf16.mxu0 %v5258_v47 }
 0x239   :  { %v2690_v1 = vpop.f32.mrb[0].mxu0 }
 0x23a   :  { %3089 = vmatpush1.bf16.msra.mxu0 %v5256_v63  ;;  %v4616_v25 = vadd.f32 %v2690_v1, %v5810_v52  ;;  %v2692_v3 = vpop.f32.mrb[1].mxu0  ;;  %v5300_v52 = vld [vmem:[#allocation4 + $0xc8] sm:$0xff]  }
 0x23b   :  { %v4617_v55 = vadd.f32 %v2692_v3, %v5812_v53  ;;  %3090 = vmatprep.subr.bf16.mxu0 %v5263_v8  ;;  %v2694_v5 = vpop.f32.mrb[2].mxu0 }
 0x23c   :  { %v4618_v58 = vadd.f32 %v2694_v5, %v5814_v56  ;;  %v2696_v9 = vpop.f32.mrb[3].mxu0 }
 0x23d   :  { %v4619_v32 = vadd.f32 %v2696_v9, %v5816_v59 }
 0x23e   :  { %v3133_v12 = vpack.c.bf16 %v4618_v58, %v4616_v25  ;;  %3091 = vmatpush1.bf16.msra.mxu0 %v5261_v28  ;;  %v5315_v28 = vld [vmem:[#allocation4 + $0x100] sm:$0xff]  }
 0x23f   :  { %v3134_v17 = vpack.c.bf16 %v4619_v32, %v4617_v55  ;;  %3092 = vmatprep.subr.bf16.mxu0 %v5268_v7  ;;  %v5316_v55 = vld [vmem:[#allocation4 + $0x148] sm:$0xff]   ;;  %v5318_v7 = vld [vmem:[#allocation4 + $0x150] sm:$0xff]  }
 0x240   :  { %v5319_v32 = vld [vmem:[#allocation4 + $0x110] sm:$0xff]  }
 0x241   :  { %v2700_v39 = vpop.f32.mrb[4].mxu0  ;;  %3561 = vmatprep.mubr.bf16.mxu1 %v3134_v17  ;;  %v5322_v17 = vld [vmem:[#allocation4 + $0x160] sm:$0xff]  }
 0x242   :  { %3093 = vmatpush1.bf16.msra.mxu0 %v5266_v15  ;;  %v4620_v53 = vadd.f32 %v2700_v39, %v5818_v0  ;;  %v2702_v10 = vpop.f32.mrb[5].mxu0  ;;  %3562 = vmatmul.mubr.bf16.vlgmr.msra.gmra.mrb[16].mxu1 %v3133_v12  ;;  %v5274_v0 = vld [vmem:[#allocation2 + $0xa90] ss:$24 sps:$4 sm:$0xff]   ;;  %v5320_v12 = vld [vmem:[#allocation4 + $0x158] sm:$0xff]  }
 0x243   :  { %v4621_v56 = vadd.f32 %v2702_v10, %v5820_v2  ;;  %3094 = vmatprep.subr.bf16.mxu0 %v5273_v36  ;;  %v2704_v59 = vpop.f32.mrb[6].mxu0  ;;  %4532 = vmatpush3.bf16.msra.mxu1 %v5299_v18  ;;  %v5303_v2 = vld [vmem:[#allocation4 + $0x90] sm:$0xff]   ;;  %v5321_v15 = vld [vmem:[#allocation4 + $0x118] sm:$0xff]   ;;  %v5323_v36 = vld [vmem:[#allocation4 + $0x120] sm:$0xff]  }
 0x244   :  { %v4622_v27 = vadd.f32 %v2704_v59, %v5822_v13  ;;  %v2706_v29 = vpop.f32.mrb[7].mxu0  ;;  %4533 = vmatprep.subr.bf16.mxu1 %v5300_v52  ;;  %v5282_v13 = vld [vmem:[#allocation2 + $0xaf4] ss:$24 sps:$4 sm:$0xff]   ;;  %v5328_v10 = vld [vmem:[#allocation4 + $0x178] sm:$0xff]  }
 0x245   :  { %v4623_v31 = vadd.f32 %v2706_v29, %v5824_v11  ;;  %v5306_v11 = vld [vmem:[#allocation4 + $0xe0] sm:$0xff]   ;;  %v5324_v18 = vld [vmem:[#allocation4 + $0x168] sm:$0xff]   ;;  %v5326_v39 = vld [vmem:[#allocation4 + $0x170] sm:$0xff]  }
 0x246   :  { %v3139_v33 = vpack.c.bf16 %v4622_v27, %v4620_v53  ;;  %3095 = vmatpush1.bf16.msra.mxu0 %v5271_v16  ;;  %v5325_v52 = vld [vmem:[#allocation4 + $0x128] sm:$0xff]   ;;  %v5327_v53 = vld [vmem:[#allocation4 + $0x130] sm:$0xff]   ;;  %v5329_v16 = vld [vmem:[#allocation4 + $0x138] sm:$0xff]  }
 0x247   :  { %v3140_v19 = vpack.c.bf16 %v4623_v31, %v4621_v56  ;;  %3096 = vmatprep.subr.bf16.mxu0 %v5276_v20  ;;  %4534 = vmatpush3.bf16.msra.mxu1 %v5301_v24 }
 0x248   :  { %4535 = vmatprep.subr.bf16.mxu1 %v5302_v30 }
 0x249   :  { %3569 = vmatprep.mubr.bf16.mxu1 %v3140_v19 }
 0x24a   :  { %3097 = vmatpush1.bf16.msra.mxu0 %v5274_v0  ;;  %3570 = vmatmul.mubr.bf16.gmra.mrb[20].mxu1 %v3139_v33 }
 0x24b   :  { %3098 = vmatprep.subr.bf16.mxu0 %v5279_v35  ;;  %4536 = vmatpush3.bf16.msra.mxu1 %v5303_v2 }
 0x24c   :  { %4537 = vmatprep.subr.bf16.mxu1 %v5304_v37 }
 0x24e   :  { %3099 = vmatpush1.bf16.msra.mxu0 %v5277_v38 }
 0x24f   :  { %3100 = vmatprep.subr.bf16.mxu0 %v5282_v13  ;;  %4538 = vmatpush3.bf16.msra.mxu1 %v5305_v40 }
 0x250   :  { %4539 = vmatprep.subr.bf16.mxu1 %v5306_v11 }
 0x252   :  { %3101 = vmatpush1.bf16.msra.mxu0 %v5280_v41 }
 0x253   :  { %3102 = vmatprep.subr.bf16.mxu0 %v5285_v23  ;;  %4540 = vmatpush3.bf16.msra.mxu1 %v5307_v42 }
 0x254   :  { %4541 = vmatprep.subr.bf16.mxu1 %v5308_v26 }
 0x256   :  { %3103 = vmatpush1.bf16.msra.mxu0 %v5283_v43 }
 0x257   :  { %3104 = vmatprep.subr.bf16.mxu0 %v5288_v45  ;;  %4542 = vmatpush3.bf16.msra.mxu1 %v5309_v46 }
 0x258   :  { %4543 = vmatprep.subr.bf16.mxu1 %v5310_v48 }
 0x25a   :  { %3105 = vmatpush1.bf16.msra.mxu0 %v5286_v49 }
 0x25b   :  { %3106 = vmatprep.subr.bf16.mxu0 %v5291_v34  ;;  %4544 = vmatpush3.bf16.msra.mxu1 %v5311_v50 }
 0x25c   :  { %4545 = vmatprep.subr.bf16.mxu1 %v5312_v51 }
 0x25e   :  { %3107 = vmatpush1.bf16.msra.mxu0 %v5289_v22 }
 0x25f   :  { %3108 = vmatprep.subr.bf16.mxu0 %v5294_v54  ;;  %4546 = vmatpush3.bf16.msra.mxu1 %v5313_v57 }
 0x260   :  { %4559 = vmatprep.subr.bf16.mxu1 %v5314_v44 }
 0x262   :  { %3109 = vmatpush1.bf16.msra.mxu0 %v5292_v60 }
 0x263   :  { %3110 = vmatprep.subr.bf16.mxu0 %v5297_v61 }
 0x266   :  { %3111 = vmatpush1.bf16.msra.mxu0 %v5295_v62 }
 0x269   :  { %4437 = vmatmul.mubr.msk.bf16.vlgmr.msra.gmra.mrb[8].mxu0 %vm5748_vm7, %v5464_v21  ;;  %vm3680_vm7 = vcmask 1046528  }
 0x26a   :  { %4439 = vmatprep.mubr.msk.bf16.mxu0 %vm5752_vm0, %v5464_v21  ;;  %vm3766_vm0 = vcmask 1044480  }
 0x271   :  { %4441 = vmatmul.mubr.msk.bf16.gmra.mrb[12].mxu0 %vm5770_vm2, %v5464_v21  ;;  %vm3829_vm2 = vcmask 195584  }
 0x2bb   :  { %v2902_v47 = vpop.f32.mrb[8].mxu1 }
 0x2bc   :  { %v2904_v63 = vpop.f32.mrb[9].mxu1 }
 0x2bd   :  { %v2906_v8 = vpop.f32.mrb[10].mxu1 }
 0x2be   :  { %v3135_v1 = vpack.c.bf16 %v2906_v8, %v2902_v47  ;;  %v2908_v25 = vpop.f32.mrb[11].mxu1 }
 0x2bf   :  { %v3136_v3 = vpack.c.bf16 %v2908_v25, %v2904_v63 }
 0x2c1   :  { %3610 = vmatprep.mubr.bf16.mxu1 %v3136_v3 }
 0x2c2   :  { %3611 = vmatmul.mubr.bf16.vlgmr.msra.gmra.mrb[24].mxu1 %v3135_v1 }
 0x2c3   :  { %v2912_v4 = vpop.f32.mrb[12].mxu1  ;;  %4560 = vmatpush3.bf16.msra.mxu1 %v5315_v28 }
 0x2c4   :  { %v2914_v5 = vpop.f32.mrb[13].mxu1  ;;  %4561 = vmatprep.subr.bf16.mxu1 %v5316_v55 }
 0x2c5   :  { %v2916_v14 = vpop.f32.mrb[14].mxu1 }
 0x2c6   :  { %v3141_v21 = vpack.c.bf16 %v2916_v14, %v2912_v4  ;;  %v2918_v58 = vpop.f32.mrb[15].mxu1 }
 0x2c7   :  { %v3142_v9 = vpack.c.bf16 %v2918_v58, %v2914_v5  ;;  %4562 = vmatpush3.bf16.msra.mxu1 %v5317_v6 }
 0x2c8   :  { %4563 = vmatprep.subr.bf16.mxu1 %v5318_v7 }
 0x2c9   :  { %3618 = vmatprep.mubr.bf16.mxu1 %v3142_v9 }
 0x2ca   :  { %3619 = vmatmul.mubr.bf16.gmra.mrb[28].mxu1 %v3141_v21 }
 0x2cb   :  { %4564 = vmatpush3.bf16.msra.mxu1 %v5319_v32 }
 0x2cc   :  { %4565 = vmatprep.subr.bf16.mxu1 %v5320_v12 }
 0x2cf   :  { %4566 = vmatpush3.bf16.msra.mxu1 %v5321_v15 }
 0x2d0   :  { %4567 = vmatprep.subr.bf16.mxu1 %v5322_v17 }
 0x2d3   :  { %4568 = vmatpush3.bf16.msra.mxu1 %v5323_v36 }
 0x2d4   :  { %4569 = vmatprep.subr.bf16.mxu1 %v5324_v18 }
 0x2d7   :  { %4570 = vmatpush3.bf16.msra.mxu1 %v5325_v52 }
 0x2d8   :  { %4571 = vmatprep.subr.bf16.mxu1 %v5326_v39 }
 0x2db   :  { %4572 = vmatpush3.bf16.msra.mxu1 %v5327_v53 }
 0x2dc   :  { %4573 = vmatprep.subr.bf16.mxu1 %v5328_v10 }
 0x2df   :  { %4574 = vmatpush3.bf16.msra.mxu1 %v5329_v16 }
 0x315   :  { %v4519_v56 = vpop.f32.mrb[16].mxu1 }
 0x316   :  { %v4520_v59 = vpop.f32.mrb[17].mxu1 }
 0x317   :  { %v4521_v20 = vadd.f32 %v4520_v59, %v4519_v56  ;;  %v4522_v24 = vpop.f32.mrb[18].mxu1 }
 0x318   :  { %v4523_v27 = vpop.f32.mrb[19].mxu1 }
 0x319   :  { %v4524_v29 = vadd.f32 %v4523_v27, %v4522_v24 }
 0x31d   :  { %v4525_v30 = vpop.f32.mrb[20].mxu1 }
 0x31e   :  { %v4526_v31 = vpop.f32.mrb[21].mxu1 }
 0x31f   :  { %v4527_v33 = vadd.f32 %v4526_v31, %v4525_v30  ;;  %v4528_v0 = vpop.f32.mrb[22].mxu1 }
 0x320   :  { %v4529_v19 = vpop.f32.mrb[23].mxu1 }
 0x321   :  { %v4530_v35 = vadd.f32 %v4529_v19, %v4528_v0  ;;  %v5330_v19 = vld [vmem:[#allocation7] sm:$0xff]  }
 0x33c   :  { %v3114_v2 = vpop.f32.mrb[8].mxu0 }
 0x33d   :  { %v3116_v37 = vpop.f32.mrb[9].mxu0 }
 0x33e   :  { %v3118_v38 = vpop.f32.mrb[10].mxu0 }
 0x33f   :  { %v3137_v13 = vpack.c.bf16 %v3118_v38, %v3114_v2  ;;  %v3120_v40 = vpop.f32.mrb[11].mxu0  ;;  %v5331_v2 = vld [vmem:[#allocation7 + $0x8] sm:$0xff]   ;;  %v5333_v38 = vld [vmem:[#allocation7 + $0x18] sm:$0xff]  }
 0x340   :  { %v3138_v11 = vpack.c.bf16 %v3120_v40, %v3116_v37  ;;  %v5332_v37 = vld [vmem:[#allocation7 + $0x10] sm:$0xff]  }
 0x342   :  { %3659 = vmatprep.mubr.bf16.mxu1 %v3138_v11 }
 0x343   :  { %3660 = vmatmul.mubr.bf16.vlgmr.msra.gmra.mrb[32].mxu1 %v3137_v13  ;;  %v5334_v13 = vld [vmem:[#allocation7 + $0x20] sm:$0xff]  }
 0x344   :  { %v3124_v41 = vpop.f32.mrb[12].mxu0 }
 0x345   :  { %v3126_v23 = vpop.f32.mrb[13].mxu0 }
 0x346   :  { %v3128_v42 = vpop.f32.mrb[14].mxu0 }
 0x347   :  { %v3143_v26 = vpack.c.bf16 %v3128_v42, %v3124_v41  ;;  %v3130_v43 = vpop.f32.mrb[15].mxu0 }
 0x348   :  { %v3144_v45 = vpack.c.bf16 %v3130_v43, %v3126_v23 }
 0x34a   :  { %3667 = vmatprep.mubr.bf16.mxu1 %v3144_v45 }
 0x34b   :  { %3668 = vmatmul.mubr.bf16.gmra.mrb[36].mxu1 %v3143_v26 }
 0x395   :  { %v4547_v46 = vpop.f32.mrb[24].mxu1 }
 0x396   :  { %v4548_v48 = vpop.f32.mrb[25].mxu1 }
 0x397   :  { %v4549_v49 = vadd.f32 %v4548_v48, %v4547_v46  ;;  %v4550_v34 = vpop.f32.mrb[26].mxu1 }
 0x398   :  { %v4551_v50 = vpop.f32.mrb[27].mxu1 }
 0x399   :  { %v3613_v51 = vadd.f32 %v4549_v49, %v4521_v20  ;;  %v4552_v22 = vadd.f32 %v4551_v50, %v4550_v34 }
 0x39b   :  { %v3616_v54 = vadd.f32 %v4552_v22, %v4524_v29 }
 0x39d   :  { %v4553_v57 = vpop.f32.mrb[28].mxu1 }
 0x39e   :  { %v4554_v60 = vpop.f32.mrb[29].mxu1 }
 0x39f   :  { %v4555_v61 = vadd.f32 %v4554_v60, %v4553_v57  ;;  %v4556_v62 = vpop.f32.mrb[30].mxu1 }
 0x3a0   :  { %v4557_v44 = vpop.f32.mrb[31].mxu1 }
 0x3a1   :  { %v3621_v47 = vadd.f32 %v4555_v61, %v4527_v33  ;;  %v4558_v63 = vadd.f32 %v4557_v44, %v4556_v62 }
 0x3a3   :  { %v3624_v8 = vadd.f32 %v4558_v63, %v4530_v35  ;;  %v5468_v35 = vmov 0.0  }
 0x3a4   :  { %4596 = vmatprep.subr.bf16.mxu1 %v5468_v35  ;;  %4612 = vmatprep.mubr.msk.bf16.mxu1 %vm5469_vm12, %v5468_v35 }
 0x3a5   :  { %4597 = vmatpush3.bf16.msra.mxu1 %v5330_v19 }
 0x3a6   :  { %4598 = vmatprep.subr.bf16.mxu1 %v5468_v35 }
 0x3a9   :  { %4599 = vmatpush3.bf16.msra.mxu1 %v5331_v2 }
 0x3aa   :  { %4600 = vmatprep.subr.bf16.mxu1 %v5468_v35 }
 0x3ad   :  { %4601 = vmatpush3.bf16.msra.mxu1 %v5332_v37 }
 0x3ae   :  { %4602 = vmatprep.subr.bf16.mxu1 %v5468_v35 }
 0x3b1   :  { %4603 = vmatpush3.bf16.msra.mxu1 %v5333_v38 }
 0x3b2   :  { %4604 = vmatprep.subr.bf16.mxu1 %v5468_v35 }
 0x3b5   :  { %4605 = vmatpush3.bf16.msra.mxu1 %v5334_v13 }
 0x3b6   :  { %4606 = vmatprep.subr.bf16.mxu1 %v5468_v35 }
 0x416   :  { %v4575_v1 = vpop.f32.mrb[32].mxu1 }
 0x417   :  { %v4576_v25 = vpop.f32.mrb[33].mxu1 }
 0x418   :  { %v4577_v3 = vadd.f32 %v4576_v25, %v4575_v1  ;;  %v4578_v28 = vpop.f32.mrb[34].mxu1 }
 0x419   :  { %v4579_v55 = vpop.f32.mrb[35].mxu1 }
 0x41a   :  { %v5876_v4 = vadd.f32 %v4577_v3, %v3613_v51  ;;  %v4580_v6 = vadd.f32 %v4579_v55, %v4578_v28 }
 0x41c   :  { %v5878_v5 = vadd.f32 %v4580_v6, %v3616_v54  ;;  %v3681_v21 = vrot.slane %v5876_v4, 1  ;;  %v3724_v52 = vrot.slane %v5876_v4, 2  ;;  %v3767_v16 = vrot.slane %v5876_v4, 3 }
 0x41e   :  { %v4581_v7 = vpop.f32.mrb[36].mxu1  ;;  %v3682_v14 = vrot.slane %v5878_v5, 1  ;;  %v3725_v15 = vrot.slane %v5878_v5, 2  ;;  %v3768_v10 = vrot.slane %v5878_v5, 3 }
 0x41f   :  { %v4582_v58 = vpop.f32.mrb[37].mxu1 }
 0x420   :  { %v4583_v9 = vadd.f32 %v4582_v58, %v4581_v7  ;;  %v4584_v32 = vpop.f32.mrb[38].mxu1  ;;  %3689 = vrot.lane.b32.xlu1 %v3682_v14, %s5465_s0  ;;  %v3683_v12 = vsel %vm3680_vm7, %v3681_v21, %v3682_v14  ;;  %v3726_v53 = vsel %vm3723_vm15, %v3724_v52, %v3725_v15  ;;  %v3769_v56 = vsel %vm3766_vm0, %v3767_v16, %v3768_v10 }
 0x421   :  { %v4585_v17 = vpop.f32.mrb[39].mxu1  ;;  %3687 = vrot.lane.b32.xlu0 %v3683_v12, %s5465_s0 }
 0x422   :  { %v5886_v36 = vadd.f32 %v4583_v9, %v3621_v47  ;;  %v4586_v18 = vadd.f32 %v4585_v17, %v4584_v32 }
 0x424   :  { %v5889_v39 = vadd.f32 %v4586_v18, %v3624_v8  ;;  %3732 = vrot.lane.b32.xlu1 %v3725_v15, %s5466_s17  ;;  %v3684_v20 = vrot.slane %v5886_v36, 1  ;;  %v3727_v29 = vrot.slane %v5886_v36, 2  ;;  %v3770_v33 = vrot.slane %v5886_v36, 3 }
 0x425   :  { %3730 = vrot.lane.b32.xlu0 %v3726_v53, %s5466_s17 }
 0x426   :  { %v3685_v59 = vrot.slane %v5889_v39, 1  ;;  %v3728_v27 = vrot.slane %v5889_v39, 2  ;;  %v3771_v31 = vrot.slane %v5889_v39, 3 }
 0x428   :  { %3775 = vrot.lane.b32.xlu1 %v3768_v10, %s5467_s18  ;;  %v3686_v24 = vsel %vm3680_vm7, %v3684_v20, %v3685_v59  ;;  %v3729_v30 = vsel %vm3723_vm15, %v3727_v29, %v3728_v27  ;;  %v3772_v0 = vsel %vm3766_vm0, %v3770_v33, %v3771_v31  ;;  %v5335_v29 = vld [vmem:[#allocation7 + $0x28] sm:$0xff]  }
 0x429   :  { %3773 = vrot.lane.b32.xlu0 %v3769_v56, %s5467_s18  ;;  %4607 = vmatpush3.bf16.msra.mxu1 %v5335_v29 }
 0x42a   :  { %4608 = vmatprep.subr.bf16.mxu1 %v5468_v35 }
 0x42c   :  { %3693 = vrot.lane.b32.xlu1 %v3685_v59, %s5465_s0 }
 0x42d   :  { %3691 = vrot.lane.b32.xlu0 %v3686_v24, %s5465_s0 }
 0x430   :  { %3736 = vrot.lane.b32.xlu1 %v3728_v27, %s5466_s17 }
 0x431   :  { %3734 = vrot.lane.b32.xlu0 %v3729_v30, %s5466_s17 }
 0x434   :  { %3779 = vrot.lane.b32.xlu1 %v3771_v31, %s5467_s18 }
 0x435   :  { %3777 = vrot.lane.b32.xlu0 %v3772_v0, %s5467_s18 }
 0x492   :  { %v3690_v40 = vpop.permute.xlu1 %3689 }
 0x493   :  { %v3700_v11 = vadd.f32 %v3690_v40, %v5878_v5  ;;  %v3688_v41 = vpop.permute.xlu0 %3687 }
 0x494   :  { %v3699_v23 = vadd.f32 %v3688_v41, %v5876_v4 }
 0x495   :  { %v3706_v42 = vsel %vm3705_vm1, %v3700_v11, -inf }
 0x496   :  { %v3704_v26 = vsel %vm3703_vm8, %v3699_v23, -inf  ;;  %v3733_v43 = vpop.permute.xlu1 %3732 }
 0x497   :  { %v3707_v45 = vmax.f32 %v3704_v26, %v3706_v42  ;;  %v3743_v46 = vadd.f32 %v3733_v43, %v3700_v11  ;;  %v3731_v48 = vpop.permute.xlu0 %3730 }
 0x498   :  { %v3742_v49 = vadd.f32 %v3731_v48, %v3699_v23 }
 0x499   :  { %v3749_v34 = vsel %vm3748_vm9, %v3743_v46, -inf  ;;  %v3708_v50 = vrot.slane %v3707_v45, 4 }
 0x49a   :  { %v3747_v51 = vsel %vm3746_vm13, %v3742_v49, -inf  ;;  %v3776_v22 = vpop.permute.xlu1 %3775 }
 0x49b   :  { %v3750_v54 = vmax.f32 %v3747_v51, %v3749_v34  ;;  %v3786_v57 = vadd.f32 %v3776_v22, %v3743_v46  ;;  %v3774_v60 = vpop.permute.xlu0 %3773  ;;  %v3709_v44 = vmax.f32 %v3707_v45, %v3708_v50  ;;  %v5336_v22 = vld [vmem:[#allocation7 + $0x30] sm:$0xff]  }
 0x49c   :  { %v3785_v61 = vadd.f32 %v3774_v60, %v3742_v49  ;;  %4609 = vmatpush3.bf16.msra.mxu1 %v5336_v22  ;;  %v5337_v60 = vld [vmem:[#allocation7 + $0x38] sm:$0xff]  }
 0x49d   :  { %v3792_v62 = vsel %vm3791_vm6, %v3786_v57, -inf  ;;  %v3751_v47 = vrot.slane %v3750_v54, 4  ;;  %v3710_v4 = vrot.slane %v3709_v44, 2  ;;  %4610 = vmatprep.subr.bf16.mxu1 %v5468_v35 }
 0x49e   :  { %v3790_v63 = vsel %vm3789_vm10, %v3785_v61, -inf  ;;  %v3694_v8 = vpop.permute.xlu1 %3693 }
 0x49f   :  { %v3793_v1 = vmax.f32 %v3790_v63, %v3792_v62  ;;  %v3702_v25 = vadd.f32 %v3694_v8, %v5889_v39  ;;  %v3692_v3 = vpop.permute.xlu0 %3691  ;;  %v3752_v6 = vmax.f32 %v3750_v54, %v3751_v47  ;;  %v3711_v17 = vmax.f32 %v3709_v44, %v3710_v4  ;;  %v4490_v8 = vld [vmem:[#allocation6] ss:$0 sm:$0xff]  ;;  %v4491_v4 = vld [vmem:[#allocation9] ss:$0 sm:$0xff] }
 0x4a0   :  { %v3701_v28 = vadd.f32 %v3692_v3, %v5886_v36  ;;  %4611 = vmatpush3.bf16.msra.mxu1 %v5337_v60 }
 0x4a1   :  { %v3715_v55 = vsel %vm3705_vm1, %v3702_v25, -inf  ;;  %v3794_v14 = vrot.slane %v3793_v1, 4  ;;  %v3753_v18 = vrot.slane %v3752_v6, 2  ;;  %v3712_v30 = vrot.slane %v3711_v17, 1 }
 0x4a2   :  { %v3714_v5 = vsel %vm3703_vm8, %v3701_v28, -inf  ;;  %v3737_v7 = vpop.permute.xlu1 %3736 }
 0x4a3   :  { %v3716_v21 = vmax.f32 %v3714_v5, %v3715_v55  ;;  %v3745_v58 = vadd.f32 %v3737_v7, %v3702_v25  ;;  %v3735_v9 = vpop.permute.xlu0 %3734  ;;  %v3795_v39 = vmax.f32 %v3793_v1, %v3794_v14  ;;  %v3754_v31 = vmax.f32 %v3752_v6, %v3753_v18 }
 0x4a4   :  { %v3744_v32 = vadd.f32 %v3735_v9, %v3701_v28  ;;  %v3713_v41 = vmax.f32 %v3711_v17, %v3712_v30 }
 0x4a5   :  { %v3717_v12 = vrot.slane %v3716_v21, 4  ;;  %v3758_v15 = vsel %vm3748_vm9, %v3745_v58, -inf  ;;  %v3796_v0 = vrot.slane %v3795_v39, 2  ;;  %v3755_v11 = vrot.slane %v3754_v31, 1 }
 0x4a6   :  { %v3757_v52 = vsel %vm3746_vm13, %v3744_v32, -inf  ;;  %v3780_v36 = vpop.permute.xlu1 %3779 }
 0x4a7   :  { %v3718_v53 = vmax.f32 %v3716_v21, %v3717_v12  ;;  %v3759_v10 = vmax.f32 %v3757_v52, %v3758_v15  ;;  %v3788_v16 = vadd.f32 %v3780_v36, %v3745_v58  ;;  %v3778_v56 = vpop.permute.xlu0 %3777  ;;  %v3797_v23 = vmax.f32 %v3795_v39, %v3796_v0 }
 0x4a8   :  { %v3787_v59 = vadd.f32 %v3778_v56, %v3744_v32  ;;  %v3756_v49 = vmax.f32 %v3754_v31, %v3755_v11 }
 0x4a9   :  { %v3719_v20 = vrot.slane %v3718_v53, 2  ;;  %v3760_v24 = vrot.slane %v3759_v10, 4  ;;  %v3801_v27 = vsel %vm3791_vm6, %v3788_v16, -inf  ;;  %v3798_v51 = vrot.slane %v3797_v23, 1 }
 0x4aa   :  { %v3800_v33 = vsel %vm3789_vm10, %v3787_v59, -inf }
 0x4ab   :  { %v3720_v19 = vmax.f32 %v3718_v53, %v3719_v20  ;;  %v3761_v2 = vmax.f32 %v3759_v10, %v3760_v24  ;;  %v3802_v37 = vmax.f32 %v3800_v33, %v3801_v27  ;;  %v3799_v61 = vmax.f32 %v3797_v23, %v3798_v51 }
 0x4ad   :  { %v3721_v38 = vrot.slane %v3720_v19, 1  ;;  %v3762_v13 = vrot.slane %v3761_v2, 2  ;;  %v3803_v40 = vrot.slane %v3802_v37, 4 }
 0x4af   :  { %v3763_v42 = vmax.f32 %v3761_v2, %v3762_v13  ;;  %v3804_v26 = vmax.f32 %v3802_v37, %v3803_v40  ;;  %v3722_v43 = vmax.f32 %v3720_v19, %v3721_v38 }
 0x4b1   :  { %v3805_v45 = vrot.slane %v3804_v26, 2  ;;  %v3764_v46 = vrot.slane %v3763_v42, 1  ;;  %v3812_v48 = vsel %vm3811_vm3, %v3722_v43, %v3713_v41 }
 0x4b3   :  { %v3806_v34 = vmax.f32 %v3804_v26, %v3805_v45  ;;  %v3765_v50 = vmax.f32 %v3763_v42, %v3764_v46 }
 0x4b5   :  { %v3816_v54 = vsel %vm3811_vm3, %v3765_v50, %v3756_v49  ;;  %v3807_v57 = vrot.slane %v3806_v34, 1 }
 0x4b6   :  { %3817 = vrot.lane.b32.xlu0 %v3816_v54, %s5465_s0 }
 0x4b7   :  { %v3808_v62 = vmax.f32 %v3806_v34, %v3807_v57 }
 0x4b9   :  { %v3822_v44 = vsel %vm3811_vm3, %v3808_v62, %v3799_v61 }
 0x4ba   :  { %3823 = vrot.lane.b32.xlu1 %v3822_v44, %s5467_s18 }
 0x528   :  { %v3818_v47 = vpop.permute.xlu0 %3817 }
 0x529   :  { %v3826_v63 = vsel %vm3703_vm8, %v3812_v48, %v3818_v47 }
 0x52c   :  { %v3824_v1 = vpop.permute.xlu1 %3823 }
 0x52d   :  { %v3828_v25 = vsel %vm3827_vm14, %v3826_v63, %v3824_v1 }
 0x52e   :  { %v3830_v3 = vsel %vm3829_vm2, %v3828_v25, 0.0 }
 0x52f   :  { %v3838_v28 = vadd.f32 %v4490_v8, %v3830_v3 }
 0x531   :  { %v3839_v55 = vmax.f32 %v3838_v28, 0.0 }
 0x533   :  { %v4501_v35 = vpack.c.bf16 %v3839_v55, %v3839_v55 }
 0x535   :  { %4613 = vmatmul.mubr.msk.bf16.vlgmr.msra.gmra.mrb[40].mxu1 %vm4500_vm11, %v4501_v35 }
 0x608   :  { %v3948_v6 = vpop.f32.mrb[40].mxu1 }
 0x609   :  { %v3949_v5 = vadd.f32 %v4491_v4, %v3948_v6  ;;  %v4614_v7 = vpop.f32.mrb[41].mxu1 }
 0x60a   :  { %v3951_v14 = vpop.f32.mrb[42].mxu1 }
 0x60b   :  { %3954 = vst [vmem:[%s5950_s6] sm:$0xff] %v3949_v5  ;;  %v4615_v21 = vpop.f32.mrb[43].mxu1 }
 0x60c   :  { %3959 = vsyncpa [#allocation3], 1 }
 0x60d   :  { %3960 = vsyncpa [#allocation5], 1 }
 0x60e   :  { %3961 = vsyncpa [#allocation8], 1 }

</bundles_post_ra>
